<compile_context>
chip_gen: v7x
topology: tpu7x:2x2x1
jax: 0.10.0
libtpu: 0.0.40
codegen_flags: <defaults>
</compile_context>

<pallas_src>
import functools

import jax
import jax.numpy as jnp
from jax.experimental import pallas as pl
from jax.experimental.pallas import tpu as pltpu

IN_DIM, H1, H2, OUT_DIM = 460, 64, 32, 1
DEFAULT_TILE_B = 4096   # batch rows per grid step (multiple of 128; sweep 2048-8192)


def _round_up(n, m):
    return ((n + m - 1) // m) * m


def mlp_kernel(x_ref, w1_ref, b1_ref, w2_ref, b2_ref, w3_ref, b3_ref, o_ref):
    # In-kernel cast to bf16 (no extra HBM pass); layers 1/2 on the MXU, f32 accumulate.
    x = x_ref[...].astype(jnp.bfloat16)                               # (TB, 460) bf16
    h1 = jnp.dot(x, w1_ref[...], preferred_element_type=jnp.float32) + b1_ref[...]
    h1 = jnp.maximum(h1, 0.0)                                         # (TB, 64) f32
    h2 = jnp.dot(h1.astype(jnp.bfloat16), w2_ref[...],
                 preferred_element_type=jnp.float32) + b2_ref[...]
    h2 = jnp.maximum(h2, 0.0)                                         # (TB, 32) f32
    # Layer 3 (N=1) on the VPU + XLU lane-reduce instead of a 99%-padded MXU pass.
    z = jnp.sum(h2 * w3_ref[...], axis=-1, keepdims=True) + b3_ref[...]   # (TB, 1)
    # Exact sigmoid: EUP exp + f32 divide (EUP is nowhere near saturated).
    p = 1.0 / (1.0 + jnp.exp(-z))                                     # (TB, 1) f32
    # Lane-dense writeback: (TB, 1) column -> (1, TB) row (XLU transpose, idle slot).
    o_ref[...] = jnp.transpose(p)                                     # (1, TB) f32


def init_params(key):
    # Deterministic init mimicking PyTorch nn.Linear default:
    # U(-1/sqrt(fan_in), 1/sqrt(fan_in)) for weight and bias. Canonical f32 layout:
    # weights are [fan_in, fan_out] (pre-transposed so kernel does x @ W + b).
    ks = jax.random.split(key, 6)

    def linear(kw, kb, fan_in, fan_out):
        bound = 1.0 / jnp.sqrt(fan_in)
        w = jax.random.uniform(kw, (fan_in, fan_out), jnp.float32, -bound, bound)
        b = jax.random.uniform(kb, (fan_out,), jnp.float32, -bound, bound)
        return w, b

    w1, b1 = linear(ks[0], ks[1], IN_DIM, H1)
    w2, b2 = linear(ks[2], ks[3], H1, H2)
    w3, b3 = linear(ks[4], ks[5], H2, OUT_DIM)
    return (w1, b1, w2, b2, w3, b3)


def prepare_params(params):
    """Cast / reshape the canonical f32 params into the kernel layout (do once)."""
    w1, b1, w2, b2, w3, b3 = params
    return (w1.astype(jnp.bfloat16),                       # (460, 64) bf16 — unpadded
            b1.reshape(1, H1).astype(jnp.float32),
            w2.astype(jnp.bfloat16),                       # (64, 32)  bf16
            b2.reshape(1, H2).astype(jnp.float32),
            w3.reshape(1, H2).astype(jnp.float32),         # (1, 32)   f32 VPU row
            b3.reshape(1, OUT_DIM).astype(jnp.float32))


def _choose_tile(batch, tile_b):
    tile_b = max(128, _round_up(tile_b, 128))
    tb = min(tile_b, _round_up(batch, 128))
    # Guarantee >=2 grid steps when there are enough rows (v7x: 2 TCs share HBM BW).
    if batch > 256:
        tb = min(tb, _round_up(pl.cdiv(batch, 2), 128))
    # Tiny batch: single full-extent block (no alignment constraint when block == dims).
    if tb >= batch:
        tb = batch
    return tb


@functools.partial(jax.jit, static_argnames=("tile_b",))
def mlp_forward(x, kparams, tile_b=DEFAULT_TILE_B):
    w1, b1, w2, b2, w3, b3 = kparams
    batch = x.shape[0]
    tb = _choose_tile(batch, tile_b)
    n_tiles = pl.cdiv(batch, tb)
    out_width = n_tiles * tb          # lane-dense (1, out_width) output, sliced below

    flops = 2 * batch * (IN_DIM * H1 + H1 * H2 + H2 * OUT_DIM)
    bytes_accessed = (x.size * x.dtype.itemsize           # x streamed once, as-is
                      + (w1.size + w2.size) * 2           # bf16 weights (resident)
                      + (b1.size + b2.size + w3.size + b3.size) * 4
                      + out_width * 4)                    # lane-dense f32 writeback
    cost = pl.CostEstimate(flops=flops, transcendentals=batch,
                           bytes_accessed=bytes_accessed)

    # VMEM budget: double-buffered x tile (lane-padded 460->512), in-kernel bf16/f32
    # intermediates, sublane-padded (1, tb) out blocks, weights + headroom.
    lane_pad = _round_up(IN_DIM, 128)                     # 512
    x_tile_bytes = tb * lane_pad * x.dtype.itemsize
    tmp_bytes = tb * (lane_pad * 2                        # bf16 cast of the x tile
                      + lane_pad * 4                      # f32 staging (conservative)
                      + 4 * 128 * 4)                      # h1/h2/products, lane-padded
    out_tile_bytes = 8 * tb * 4                           # (1, tb) block, sublanes->8
    vmem_need = 2 * x_tile_bytes + 2 * out_tile_bytes + tmp_bytes + (2 << 20)
    vmem_limit = int(min(max(vmem_need + (8 << 20), 16 << 20), 50 << 20))

    out = pl.pallas_call(
        mlp_kernel,
        out_shape=jax.ShapeDtypeStruct((1, out_width), jnp.float32),
        grid=(n_tiles,),
        in_specs=[
            # x streamed per batch tile, unpadded last dim (= full array dim), auto
            # double-buffered.  Sweep pipeline_mode=pl.Buffered(3) if DMA is exposed.
            pl.BlockSpec((tb, IN_DIM), lambda i: (i, 0)),
            # Weights / biases: constant index_map -> DMA once, resident in VMEM.
            pl.BlockSpec((IN_DIM, H1), lambda i: (0, 0)),
            pl.BlockSpec((1, H1), lambda i: (0, 0)),
            pl.BlockSpec((H1, H2), lambda i: (0, 0)),
            pl.BlockSpec((1, H2), lambda i: (0, 0)),
            pl.BlockSpec((1, H2), lambda i: (0, 0)),
            pl.BlockSpec((1, OUT_DIM), lambda i: (0, 0)),
        ],
        out_specs=pl.BlockSpec((1, tb), lambda i: (0, i)),   # lane-dense output row
        compiler_params=pltpu.CompilerParams(
            dimension_semantics=("parallel",),
            vmem_limit_bytes=vmem_limit),
        cost_estimate=cost,
    )(x, w1, b1, w2, b2, w3, b3)
    return out[0, :batch].reshape(batch, OUT_DIM)


def mlp_reference_f32(x, params):
    # Exact PyTorch-module semantics in f32.
    w1, b1, w2, b2, w3, b3 = params
    h1 = jnp.maximum(x @ w1 + b1, 0.0)
    h2 = jnp.maximum(h1 @ w2 + b2, 0.0)
    return jax.nn.sigmoid(h2 @ w3 + b3)


def mlp_reference_bf16(x, params):
    # Mirrors the kernel's bf16-input / f32-accumulate arithmetic.
    w1, b1, w2, b2, w3, b3 = params
    h1 = jnp.dot(x.astype(jnp.bfloat16), w1.astype(jnp.bfloat16),
                 preferred_element_type=jnp.float32) + b1
    h1 = jnp.maximum(h1, 0.0)
    h2 = jnp.dot(h1.astype(jnp.bfloat16), w2.astype(jnp.bfloat16),
                 preferred_element_type=jnp.float32) + b2
    h2 = jnp.maximum(h2, 0.0)
    return jax.nn.sigmoid(h2 @ w3 + b3)


if __name__ == "__main__":
    key = jax.random.PRNGKey(0)
    kx, kp = jax.random.split(key)
    batch = 300  # > 256: exercises the 2-tile grid and the masked partial last block
    x = jax.random.normal(kx, (batch, IN_DIM), jnp.float32)
    params = init_params(kp)
    kparams = prepare_params(params)

    out = jax.block_until_ready(mlp_forward(x, kparams))
    assert out.shape == (batch, OUT_DIM)

    ref_bf16 = mlp_reference_bf16(x, params)   # same arithmetic as kernel
    ref_f32 = mlp_reference_f32(x, params)     # original module semantics
    assert jnp.allclose(out, ref_bf16, atol=2e-3, rtol=2e-3), \
        float(jnp.max(jnp.abs(out - ref_bf16)))
    assert jnp.allclose(out, ref_f32, atol=3e-2, rtol=3e-2), \
        float(jnp.max(jnp.abs(out - ref_f32)))
    print("KERNEL_OK")
</pallas_src>

<mosaic_0001>
module attributes {stable_mosaic.version = 11 : i64} {
  func.func @mlp_kernel(%arg0: i32, %arg1: memref<256x460xf32, #tpu.memory_space<vmem>>, %arg2: memref<460x64xbf16, #tpu.memory_space<vmem>>, %arg3: memref<1x64xf32, #tpu.memory_space<vmem>>, %arg4: memref<64x32xbf16, #tpu.memory_space<vmem>>, %arg5: memref<1x32xf32, #tpu.memory_space<vmem>>, %arg6: memref<1x32xf32, #tpu.memory_space<vmem>>, %arg7: memref<1x1xf32, #tpu.memory_space<vmem>>, %arg8: memref<1x256xf32, #tpu.memory_space<vmem>>) attributes {dimension_semantics = [#tpu.dimension_semantics<parallel>], iteration_bounds = array<i64: 2>, scalar_prefetch = 0 : i64, scratch_operands = 0 : i64, tpu.core_type = #tpu.core_type<tc>, window_params = [{transform_indices = @transform_0, window_bounds = array<i64: 256, 460>}, {pipeline_mode = #tpu.pipeline_mode<synchronous>, transform_indices = @transform_1, window_bounds = array<i64: 460, 64>}, {pipeline_mode = #tpu.pipeline_mode<synchronous>, transform_indices = @transform_2, window_bounds = array<i64: 1, 64>}, {pipeline_mode = #tpu.pipeline_mode<synchronous>, transform_indices = @transform_3, window_bounds = array<i64: 64, 32>}, {pipeline_mode = #tpu.pipeline_mode<synchronous>, transform_indices = @transform_4, window_bounds = array<i64: 1, 32>}, {pipeline_mode = #tpu.pipeline_mode<synchronous>, transform_indices = @transform_5, window_bounds = array<i64: 1, 32>}, {pipeline_mode = #tpu.pipeline_mode<synchronous>, transform_indices = @transform_6, window_bounds = array<i64: 1, 1>}, {transform_indices = @transform_7, window_bounds = array<i64: 1, 256>}]} {
    %c0 = arith.constant 0 : index
    %c0_0 = arith.constant 0 : index
    %0 = vector.load %arg1[%c0, %c0_0] : memref<256x460xf32, #tpu.memory_space<vmem>>, vector<256x460xf32>
    %1 = arith.truncf %0 : vector<256x460xf32> to vector<256x460xbf16>
    %c0_1 = arith.constant 0 : index
    %c0_2 = arith.constant 0 : index
    %2 = vector.load %arg2[%c0_1, %c0_2] : memref<460x64xbf16, #tpu.memory_space<vmem>>, vector<460x64xbf16>
    %cst = arith.constant dense<0.000000e+00> : vector<256x64xf32>
    %3 = tpu.matmul %1, %2, %cst {dimension_numbers = #tpu.dot_dimension_numbers<[1], [0], [0], [1], [0, 0, 1, 1], [], []>} : vector<256x460xbf16>, vector<460x64xbf16>, vector<256x64xf32> -> vector<256x64xf32>
    %c0_3 = arith.constant 0 : index
    %c0_4 = arith.constant 0 : index
    %4 = vector.load %arg3[%c0_3, %c0_4] : memref<1x64xf32, #tpu.memory_space<vmem>>, vector<1x64xf32>
    %5 = vector.broadcast %4 : vector<1x64xf32> to vector<256x64xf32>
    %6 = arith.addf %3, %5 : vector<256x64xf32>
    %cst_5 = arith.constant 0.000000e+00 : f32
    %7 = vector.broadcast %cst_5 : f32 to vector<256x64xf32>
    %8 = arith.maximumf %6, %7 : vector<256x64xf32>
    %9 = arith.truncf %8 : vector<256x64xf32> to vector<256x64xbf16>
    %c0_6 = arith.constant 0 : index
    %c0_7 = arith.constant 0 : index
    %10 = vector.load %arg4[%c0_6, %c0_7] : memref<64x32xbf16, #tpu.memory_space<vmem>>, vector<64x32xbf16>
    %cst_8 = arith.constant dense<0.000000e+00> : vector<256x32xf32>
    %11 = tpu.matmul %9, %10, %cst_8 {dimension_numbers = #tpu.dot_dimension_numbers<[1], [0], [0], [1], [0, 0, 1, 1], [], []>} : vector<256x64xbf16>, vector<64x32xbf16>, vector<256x32xf32> -> vector<256x32xf32>
    %c0_9 = arith.constant 0 : index
    %c0_10 = arith.constant 0 : index
    %12 = vector.load %arg5[%c0_9, %c0_10] : memref<1x32xf32, #tpu.memory_space<vmem>>, vector<1x32xf32>
    %13 = vector.broadcast %12 : vector<1x32xf32> to vector<256x32xf32>
    %14 = arith.addf %11, %13 : vector<256x32xf32>
    %cst_11 = arith.constant 0.000000e+00 : f32
    %15 = vector.broadcast %cst_11 : f32 to vector<256x32xf32>
    %16 = arith.maximumf %14, %15 : vector<256x32xf32>
    %c0_12 = arith.constant 0 : index
    %c0_13 = arith.constant 0 : index
    %17 = vector.load %arg6[%c0_12, %c0_13] : memref<1x32xf32, #tpu.memory_space<vmem>>, vector<1x32xf32>
    %18 = vector.broadcast %17 : vector<1x32xf32> to vector<256x32xf32>
    %19 = arith.mulf %16, %18 : vector<256x32xf32>
    %cst_14 = arith.constant dense<0.000000e+00> : vector<256xf32>
    %20 = vector.multi_reduction <add>, %19, %cst_14 [1] : vector<256x32xf32> to vector<256xf32>
    %21 = vector.shape_cast %20 : vector<256xf32> to vector<256x1xf32>
    %c0_15 = arith.constant 0 : index
    %c0_16 = arith.constant 0 : index
    %22 = vector.load %arg7[%c0_15, %c0_16] : memref<1x1xf32, #tpu.memory_space<vmem>>, vector<1x1xf32>
    %23 = vector.broadcast %22 : vector<1x1xf32> to vector<256x1xf32>
    %24 = arith.addf %21, %23 : vector<256x1xf32>
    %cst_17 = arith.constant 0.000000e+00 : f32
    %25 = vector.broadcast %cst_17 : f32 to vector<256x1xf32>
    %26 = arith.subf %25, %24 : vector<256x1xf32>
    %27 = math.exp %26 : vector<256x1xf32>
    %cst_18 = arith.constant 1.000000e+00 : f32
    %28 = vector.broadcast %cst_18 : f32 to vector<256x1xf32>
    %29 = arith.addf %28, %27 : vector<256x1xf32>
    %cst_19 = arith.constant 1.000000e+00 : f32
    %30 = vector.broadcast %cst_19 : f32 to vector<256x1xf32>
    %31 = arith.divf %30, %29 : vector<256x1xf32>
    %32 = tpu.transpose %31, [1, 0] : vector<256x1xf32> -> vector<1x256xf32>
    %c0_20 = arith.constant 0 : index
    %c0_21 = arith.constant 0 : index
    %33 = vector.load %arg8[%c0_20, %c0_21] : memref<1x256xf32, #tpu.memory_space<vmem>>, vector<1x256xf32>
    tpu.vector_store %arg8[%c0_20, %c0_21], %32 {strides = array<i32>} : memref<1x256xf32, #tpu.memory_space<vmem>>, vector<1x256xf32>,
    return
  }
  func.func @transform_0(%arg0: i32) -> (i32, i32) {
    %c0_i32 = arith.constant 0 : i32
    %c0_i32_0 = arith.constant 0 : i32
    return %arg0, %c0_i32 : i32, i32
  }
  func.func @transform_1(%arg0: i32) -> (i32, i32) {
    %c0_i32 = arith.constant 0 : i32
    %c0_i32_0 = arith.constant 0 : i32
    %c0_i32_1 = arith.constant 0 : i32
    return %c0_i32, %c0_i32_0 : i32, i32
  }
  func.func @transform_2(%arg0: i32) -> (i32, i32) {
    %c0_i32 = arith.constant 0 : i32
    %c0_i32_0 = arith.constant 0 : i32
    %c0_i32_1 = arith.constant 0 : i32
    return %c0_i32, %c0_i32_0 : i32, i32
  }
  func.func @transform_3(%arg0: i32) -> (i32, i32) {
    %c0_i32 = arith.constant 0 : i32
    %c0_i32_0 = arith.constant 0 : i32
    %c0_i32_1 = arith.constant 0 : i32
    return %c0_i32, %c0_i32_0 : i32, i32
  }
  func.func @transform_4(%arg0: i32) -> (i32, i32) {
    %c0_i32 = arith.constant 0 : i32
    %c0_i32_0 = arith.constant 0 : i32
    %c0_i32_1 = arith.constant 0 : i32
    return %c0_i32, %c0_i32_0 : i32, i32
  }
  func.func @transform_5(%arg0: i32) -> (i32, i32) {
    %c0_i32 = arith.constant 0 : i32
    %c0_i32_0 = arith.constant 0 : i32
    %c0_i32_1 = arith.constant 0 : i32
    return %c0_i32, %c0_i32_0 : i32, i32
  }
  func.func @transform_6(%arg0: i32) -> (i32, i32) {
    %c0_i32 = arith.constant 0 : i32
    %c0_i32_0 = arith.constant 0 : i32
    %c0_i32_1 = arith.constant 0 : i32
    return %c0_i32, %c0_i32_0 : i32, i32
  }
  func.func @transform_7(%arg0: i32) -> (i32, i32) {
    %c0_i32 = arith.constant 0 : i32
    %c0_i32_0 = arith.constant 0 : i32
    return %c0_i32, %arg0 : i32, i32
  }
}

</mosaic_0001>

<bundles_post_ra>
// kernel: mlp_forward.1
= control target key start
LH: loop header
LB: loop body
LE: loop exit
PB: predicated region body
PF: predicated region fallthrough
CT: control target
= control target key end

     0   :  { %s3101_s0 = inlined_call_operand.hbm [shape: f32[300,460], index: 0, kind: input, shape index: {}]   ;;  %s3102_s1 = inlined_call_operand.vmem [shape: bf16[460,64], index: 1, kind: input, shape index: {}]   ;;  %s3103_s2 = inlined_call_operand.vmem [shape: f32[1,64], index: 2, kind: input, shape index: {}]   ;;  %s3104_s3 = inlined_call_operand.vmem [shape: bf16[64,32], index: 3, kind: input, shape index: {}]   ;;  %s3105_s4 = inlined_call_operand.vmem [shape: f32[1,32], index: 4, kind: input, shape index: {}]   ;;  %s3106_s5 = inlined_call_operand.vmem [shape: f32[1,32], index: 5, kind: input, shape index: {}]   ;;  %s3107_s6 = inlined_call_operand.<no memory space> [shape: f32[1,1], index: 6, kind: input, shape index: {}]   ;;  %s3108_s7 = inlined_call_operand.vmem [shape: f32[1,512], index: 7, kind: output, shape index: {}]  }
   0x1   :  { %v12_v0 = vstv %s3107_s6 }
   0x2   :  { %13 = vst [vmem:[#allocation2] sm:$0x1] %v12_v0 }
   0x3   :  { %14 = vsyncpa [#allocation4], 0 }
   0x4   :  { %16 = vsyncpa [#allocation4 + $0x1], 0  ;;  %s2544_s26 = smov 0   ;;  %s2546_s27 = smov 0  }
   0x5   :  { %s2548_s28 = smov 0   ;;  %s2550_s29 = smov 0  }
   0x6 LB: > { %s1964_s6 = sadd.s32 4294967295, %s2494_s29   ;;  %s2564_s30 = sadd.s32 1, %s2494_s29   ;;  %s2494_s29 = sphi %s2550_s29, %s3113_s29   ;;  %s2490_s28 = sphi %s2548_s28, %s3112_s28   ;;  %s2486_s27 = sphi %s2546_s27, %s3111_s27   ;;  %s2482_s26 = sphi %s2544_s26, %s3110_s26  }
   0x7   : > { %s26_s8 = ssub.s32 %s2494_s29, %s2564_s30  ;;  %s29_s9 = sadd.s32 1, %s2490_s28 }
   0x8   : > { %p27_p0 = scmp.eq.s32.totalorder %s26_s8, 0  ;;  %p36_p1 = scmp.ne.s32.totalorder %s2490_s28, %s2486_s27 }
   0x9   : > { %p37_p2 = scmp.eq.s32.totalorder %s2494_s29, 0  ;;  %p42_p3 = scmp.ne.s32.totalorder %s2486_s27, %s2482_s26 }
   0xa   : > { %s2574_s10 = scalar_select %p27_p0, %s2490_s28, %s29_s9  }
   0xb   : > { %p38_p4 = por %p37_p2, %p36_p1  ;;  %p43_p5 = scmp.eq.s32.totalorder %s1964_s6, 0 }
   0xc   : > { %p1967_p7 = scmp.ge.s32.totalorder %s2494_s29, 2 }
   0xd   : > { %p2578_p6 = por %p43_p5, %p42_p3 }
   0xe   : > { %232 = sbr.rel (%p1967_p7) target bundleno = 56 (0x38), region = 40 }
  0x15   : > { %235 = sbr.rel (!%p38_p4) target bundleno = 56 (0x38), region = 44  ;;  %s236_s12 = sand.u32 (%p38_p4), 1, %s2490_s28  }
  0x16   : > { %s1969_s13 = sshll.u32 (%p38_p4), %s2494_s29, 5  ;;  %s1968_s14 = sshll.u32 (%p38_p4), %s236_s12, 10 }
  0x17   : > { %s242_s15 = ssub.s32 (%p38_p4), 38, %s1969_s13  ;;  %s2588_s18 = scalar_lea.sflag (%p38_p4), [#allocation4], %s236_s12 }
  0x18   : > { %p243_p8 = scmp.lt.s32.totalorder (%p38_p4), %s242_s15, 32  ;;  %s240_s19 = scalar_lea.vmem (%p38_p4), [#allocation3], %s1968_s14 }
  0x1c   : > { %s3115_s15 = smov (!%p243_p8, %s242_s15), 32 }
  0x1d   : > { %s2585_s16 = sshll.u32 %s3115_s15, 9 }
  0x1e   : > { %s248_s17 = ssub.s32 16384, %s2585_s16 }
  0x1f   : > { %249 = vsyncadd %s2588_s18, %s248_s17  ;;  %p1972_p9 = scmp.ne.s32.totalorder %s2585_s16, 0  ;;  %s2053_s20 = sshll.u32 %s2494_s29, 14 }
  0x20   : > { %s2596_s23 = scalar_lea.hbm %s3101_s0, %s2053_s20  ;;  %s255_s24 = sshll.u32 %s240_s19, 4  ;;  %s2598_s24 = int_to_ptr.vmem [resolvable:$true] %s255_s24 }
  0x21   : > { %s2432_s25 = scalar_lea.hbm %s2596_s23, %s2585_s16  ;;  %s2436_s9 = scalar_lea.hbm %s3101_s0, 19456 }
  0x22   : > { %p2433_p10 = scmp.ne.s32.totalorder %s2596_s23, %s2432_s25  ;;  %p2437_p13 = scmp.lt.u32.totalorder %s2596_s23, %s3101_s0 }
  0x23   : > { %p2438_p0 = scmp.lt.u32.totalorder %s2436_s9, %s2432_s25  ;;  %p2440_p2 = scmp.lt.u32.totalorder %s2432_s25, %s2596_s23 }
  0x24   : > { %p2434_p11 = pnand %p2433_p10, %p1972_p9 }
  0x25   : > { %p2439_p1 = por %p2438_p0, %p2437_p13 }
  0x26   : > { %p2435_p12 = pneg %p2434_p11 }
  0x27   : > { %p2441_p3 = por %p2440_p2, %p2439_p1 }
  0x29   : > { %p2442_p4 = pnand %p2441_p3, %p2435_p12 }
  0x2b   : > { %2445 = shalt.err (!%p2442_p4)
}
  0x2c   : > { %s2446_s14 = scalar_lea.vmem %s2598_s24, %s2585_s16  ;;  %s2496_s15 = smov [#allocation3]  }
  0x2d   : > { %p2447_p5 = scmp.ne.s32.totalorder %s2598_s24, %s2446_s14  ;;  %s2450_s17 = sshll.u32 %s2496_s15, 4  ;;  %s2451_s17 = int_to_ptr.vmem [resolvable:$false] %s2450_s17 }
  0x2e   : > { %s2452_s19 = scalar_lea.vmem %s2451_s17, 32768  ;;  %p2453_p10 = scmp.lt.s32.totalorder %s2598_s24, %s2451_s17 }
  0x2f   : > { %p2448_p7 = pnand %p2447_p5, %p1972_p9  ;;  %p2454_p11 = scmp.lt.s32.totalorder %s2452_s19, %s2446_s14 }
  0x31   : > { %p2449_p8 = pneg %p2448_p7  ;;  %p2455_p13 = por %p2454_p11, %p2453_p10 }
  0x33   : > { %p2456_p0 = pnand %p2455_p13, %p2449_p8 }
  0x35   : > { %2459 = shalt.err (!%p2456_p0)
}
  0x36   : > { %s2497_s20 = smov 512   ;;  %s2498_s21 = smov 32  }
  0x37   : > { %261 = dma.hbm_to_vmem [thread:$0]  (%p1972_p9), %s2596_s23, %s2585_s16, %s2598_s24, %s2588_s18, %s2497_s20, %s2497_s20, %s2498_s21  }
  0x38 PF: > { %p1977_p12 = scmp.ge.s32.totalorder %s2494_s29, 1  ;;  %p263_p1 = scmp.lt.s32.totalorder %s2494_s29, 3 }
  0x3a   : > { %p264_p2 = pnand %p1977_p12, %p263_p1 }
  0x3b   : > { %s269_s22 = sand.u32 (!%p264_p2), 1, %s2486_s27  }
  0x3c   : > { %267 = sbr.rel (%p264_p2) target bundleno = 950 (0x3b6), region = 48  ;;  %s1978_s25 = sshll.u32 (!%p264_p2), %s269_s22, 10 }
  0x3d   : > { %s270_s26 = scalar_lea.sflag (!%p264_p2), [#allocation4], %s269_s22  ;;  %s2628_s8 = scalar_lea.vmem (!%p264_p2), [#allocation3], %s1978_s25 }
  0x43   : > { %2477 = dma.done.wait (%p2578_p6), %s270_s26, 16384  }
  0x44   : > { %2479 = vsyncadd (%p2578_p6), %s270_s26, 4294950912  ;;  %v2499_v1 = vmov 0   ;;  %v2271_v2 = vld [vmem:[%s3102_s1 + $0x80] sm:$0xff]   ;;  %v2272_v3 = vld [vmem:[%s3102_s1 + $0x88] sm:$0xff]   ;;  %vm745_vm0 = vcmask 621568   ;;  %vm794_vm1 = vcmask 1045504  }
  0x45   : > { %959 = vmatprep.subr.bf16.mxu1 %v2499_v1  ;;  %v2274_v4 = vld [vmem:[%s3102_s1 + $0x40] sm:$0xff]   ;;  %v2273_v6 = vld [vmem:[%s3102_s1 + $0x90] sm:$0xff]   ;;  %v2277_v7 = vld [vmem:[%s3102_s1 + $0x48] sm:$0xff]   ;;  %vm1207_vm2 = vcmask 523264   ;;  %vm1488_vm3 = vcmask 261120   ;;  %s1979_s24 = sshll.u32 %s1964_s6, 1 }
  0x46   : > { %960 = vmatpush1.bf16.msra.mxu1 %v2271_v2  ;;  %v2275_v5 = vld [vmem:[%s3102_s1] sm:$0xff]   ;;  %2054 = vmatprep.subr.bf16.mxu0 %v2274_v4  ;;  %v2278_v8 = vld [vmem:[%s3102_s1 + $0x8] sm:$0xff]   ;;  %v2276_v9 = vld [vmem:[%s3102_s1 + $0x98] sm:$0xff]   ;;  %p310_p6 = scmp.lt.s32.totalorder %s1979_s24, 3 }
  0x47   : > { %961 = vmatprep.subr.bf16.mxu1 %v2499_v1  ;;  %2055 = vmatpush3.bf16.msra.mxu0 %v2275_v5  ;;  %v2280_v10 = vld [vmem:[%s3102_s1 + $0x50] sm:$0xff]   ;;  %v2283_v12 = vld [vmem:[%s3102_s1 + $0x58] sm:$0xff]   ;;  %v2279_v13 = vld [vmem:[%s3102_s1 + $0xa0] sm:$0xff]  }
  0x48   : > { %2056 = vmatprep.subr.bf16.mxu0 %v2277_v7  ;;  %v2281_v11 = vld [vmem:[%s3102_s1 + $0x10] sm:$0xff]   ;;  %v2284_v14 = vld [vmem:[%s3102_s1 + $0x18] sm:$0xff]   ;;  %v2286_v15 = vld [vmem:[%s3102_s1 + $0x60] sm:$0xff]   ;;  %s3117_s24 = smov (!%p310_p6, %s1979_s24), 3 }
  0x49   : > { %v2282_v16 = vld [vmem:[%s3102_s1 + $0xa8] sm:$0xff]   ;;  %v2287_v17 = vld [vmem:[%s3102_s1 + $0x20] sm:$0xff]   ;;  %v2285_v19 = vld [vmem:[%s3102_s1 + $0xb0] sm:$0xff]   ;;  %s312_s11 = scalar_lea.vmem %s3108_s7, %s3117_s24 }
  0x4a   : > { %962 = vmatpush1.bf16.msra.mxu1 %v2272_v3  ;;  %v2289_v18 = vld [vmem:[%s3102_s1 + $0x68] sm:$0xff]   ;;  %v2292_v21 = vld [vmem:[%s3102_s1 + $0x70] sm:$0xff]   ;;  %v2288_v22 = vld [vmem:[%s3102_s1 + $0xb8] sm:$0xff]  }
  0x4b   : > { %963 = vmatprep.subr.bf16.mxu1 %v2499_v1  ;;  %2057 = vmatpush3.bf16.msra.mxu0 %v2278_v8  ;;  %v2290_v20 = vld [vmem:[%s3102_s1 + $0x28] sm:$0xff]   ;;  %v2293_v23 = vld [vmem:[%s3102_s1 + $0x30] sm:$0xff]   ;;  %v2295_v24 = vld [vmem:[%s3102_s1 + $0x78] sm:$0xff]  }
  0x4c   : > { %2058 = vmatprep.subr.bf16.mxu0 %v2280_v10  ;;  %v316_v25 = vld [vmem:[%s2628_s8 + $0x8] sm:$0xff]  ;;  %v2291_v27 = vld [vmem:[%s3102_s1 + $0xc0] sm:$0xff]   ;;  %v2296_v29 = vld [vmem:[%s3102_s1 + $0x38] sm:$0xff]  }
  0x4d   : > { %v320_v26 = vld [vmem:[%s2628_s8 + $0x28] sm:$0xff]  ;;  %v315_v30 = vld [vmem:[%s2628_s8] sm:$0xff]  ;;  %v318_v34 = vld [vmem:[%s2628_s8 + $0x18] sm:$0xff] }
  0x4e   : > { %964 = vmatpush1.bf16.msra.mxu1 %v2273_v6  ;;  %v444_v28 = vpack.c.bf16 %v320_v26, %v316_v25  ;;  %v319_v31 = vld [vmem:[%s2628_s8 + $0x20] sm:$0xff]  ;;  %v324_v32 = vld [vmem:[%s2628_s8 + $0x48] sm:$0xff]  ;;  %v322_v35 = vld [vmem:[%s2628_s8 + $0x38] sm:$0xff] }
  0x4f   : > { %965 = vmatprep.subr.bf16.mxu1 %v2499_v1  ;;  %2059 = vmatpush3.bf16.msra.mxu0 %v2281_v11  ;;  %v328_v33 = vld [vmem:[%s2628_s8 + $0x68] sm:$0xff]  ;;  %v446_v36 = vpack.c.bf16 %v322_v35, %v318_v34  ;;  %v443_v37 = vpack.c.bf16 %v319_v31, %v315_v30  ;;  %v323_v41 = vld [vmem:[%s2628_s8 + $0x40] sm:$0xff]  ;;  %v2298_v46 = vld [vmem:[%s3102_s1 + $0xd8] sm:$0xff]  }
  0x50   : > { %2060 = vmatprep.subr.bf16.mxu0 %v2283_v12  ;;  %830 = vmatprep.mubr.bf16.mxu0 %v444_v28  ;;  %v2294_v38 = vld [vmem:[%s3102_s1 + $0xc8] sm:$0xff]   ;;  %v448_v39 = vpack.c.bf16 %v328_v33, %v324_v32  ;;  %v2297_v40 = vld [vmem:[%s3102_s1 + $0xd0] sm:$0xff]   ;;  %v2299_v48 = vld [vmem:[%s3102_s1 + $0xe0] sm:$0x3f]  }
  0x51   : > { %2010 = vmatprep.mubr.msk.bf16.mxu1 %vm745_vm0, %v446_v36  ;;  %v327_v42 = vld [vmem:[%s2628_s8 + $0x60] sm:$0xff]  ;;  %v332_v43 = vld [vmem:[%s2628_s8 + $0x88] sm:$0xff]  ;;  %v317_v49 = vld [vmem:[%s2628_s8 + $0x10] sm:$0xff]  ;;  %v796_v54 = vsel %vm794_vm1, %v2299_v48, 0 }
  0x52   : > { %966 = vmatpush1.bf16.msra.mxu1 %v2276_v9  ;;  %v336_v44 = vld [vmem:[%s2628_s8 + $0xa8] sm:$0xff]  ;;  %v447_v45 = vpack.c.bf16 %v327_v42, %v323_v41  ;;  %v321_v50 = vld [vmem:[%s2628_s8 + $0x30] sm:$0xff]  ;;  %v326_v51 = vld [vmem:[%s2628_s8 + $0x58] sm:$0xff] }
  0x53   : > { %967 = vmatprep.subr.bf16.mxu1 %v2499_v1  ;;  %2061 = vmatpush3.bf16.msra.mxu0 %v2284_v14  ;;  %v452_v47 = vpack.c.bf16 %v336_v44, %v332_v43  ;;  %v331_v52 = vld [vmem:[%s2628_s8 + $0x80] sm:$0xff]  ;;  %v330_v55 = vld [vmem:[%s2628_s8 + $0x78] sm:$0xff]  ;;  %v340_v56 = vld [vmem:[%s2628_s8 + $0xc8] sm:$0xff]  ;;  %v445_v58 = vpack.c.bf16 %v321_v50, %v317_v49 }
  0x54   : > { %2062 = vmatprep.subr.bf16.mxu0 %v2286_v15  ;;  %v335_v53 = vld [vmem:[%s2628_s8 + $0xa0] sm:$0xff]  ;;  %v344_v57 = vld [vmem:[%s2628_s8 + $0xe8] sm:$0xff]  ;;  %v450_v60 = vpack.c.bf16 %v330_v55, %v326_v51  ;;  %v325_v62 = vld [vmem:[%s2628_s8 + $0x50] sm:$0xff] }
  0x55   : > { %v451_v59 = vpack.c.bf16 %v335_v53, %v331_v52  ;;  %v456_v61 = vpack.c.bf16 %v344_v57, %v340_v56  ;;  %v329_v63 = vld [vmem:[%s2628_s8 + $0x70] sm:$0xff]  ;;  %v334_v0 = vld [vmem:[%s2628_s8 + $0x98] sm:$0xff]  ;;  %v343_v2 = vld [vmem:[%s2628_s8 + $0xe0] sm:$0xff] }
  0x56   : > { %968 = vmatpush1.bf16.msra.mxu1 %v2279_v13  ;;  %v338_v3 = vld [vmem:[%s2628_s8 + $0xb8] sm:$0xff]  ;;  %v348_v4 = vld [vmem:[%s2628_s8 + $0x108] sm:$0xff]  ;;  %v449_v6 = vpack.c.bf16 %v329_v63, %v325_v62  ;;  %v333_v10 = vld [vmem:[%s2628_s8 + $0x90] sm:$0xff] }
  0x57   : > { %969 = vmatprep.subr.bf16.mxu1 %v2499_v1  ;;  %2063 = vmatpush3.bf16.msra.mxu0 %v2287_v17  ;;  %v352_v5 = vld [vmem:[%s2628_s8 + $0x128] sm:$0xff]  ;;  %v454_v8 = vpack.c.bf16 %v338_v3, %v334_v0  ;;  %v337_v11 = vld [vmem:[%s2628_s8 + $0xb0] sm:$0xff]  ;;  %v342_v12 = vld [vmem:[%s2628_s8 + $0xd8] sm:$0xff] }
  0x58   : > { %2064 = vmatprep.subr.bf16.mxu0 %v2289_v18  ;;  %v460_v9 = vpack.c.bf16 %v352_v5, %v348_v4  ;;  %v347_v13 = vld [vmem:[%s2628_s8 + $0x100] sm:$0xff]  ;;  %v346_v15 = vld [vmem:[%s2628_s8 + $0xf8] sm:$0xff]  ;;  %v360_v17 = vld [vmem:[%s2628_s8 + $0x168] sm:$0xff]  ;;  %v453_v18 = vpack.c.bf16 %v337_v11, %v333_v10 }
  0x59   : > { %v351_v14 = vld [vmem:[%s2628_s8 + $0x120] sm:$0xff]  ;;  %v354_v25 = vld [vmem:[%s2628_s8 + $0x138] sm:$0xff]  ;;  %v364_v28 = vld [vmem:[%s2628_s8 + $0x188] sm:$0xff] }
  0x5a   : > { %970 = vmatpush1.bf16.msra.mxu1 %v2282_v16  ;;  %v356_v16 = vld [vmem:[%s2628_s8 + $0x148] sm:$0xff]  ;;  %v355_v26 = vld [vmem:[%s2628_s8 + $0x140] sm:$0xff]  ;;  %v362_v42 = vld [vmem:[%s2628_s8 + $0x178] sm:$0xff] }
  0x5b   : > { %971 = vmatprep.subr.bf16.mxu1 %v2499_v1  ;;  %2065 = vmatpush3.bf16.msra.mxu0 %v2290_v20  ;;  %v458_v20 = vpack.c.bf16 %v346_v15, %v342_v12  ;;  %v2300_v30 = vld [vmem:[%s3104_s3] sm:$0xff]   ;;  %v2301_v33 = vld [vmem:[%s3104_s3 + $0x8] sm:$0xff]   ;;  %v2302_v36 = vld [vmem:[%s3104_s3 + $0x10] sm:$0xff]  }
  0x5c   : > { %2066 = vmatprep.subr.bf16.mxu0 %v2292_v21  ;;  %v464_v21 = vpack.c.bf16 %v360_v17, %v356_v16  ;;  %v367_v41 = vld [vmem:[%s2628_s8 + $0x1a0] sm:$0xff]  ;;  %v372_v43 = vld [vmem:[%s2628_s8 + $0x1c8] sm:$0xff]  ;;  %v357_v49 = vld [vmem:[%s2628_s8 + $0x150] sm:$0xff] }
  0x5d   : > { %v376_v44 = vld [vmem:[%s2628_s8 + $0x1e8] sm:$0xff]  ;;  %v361_v50 = vld [vmem:[%s2628_s8 + $0x170] sm:$0xff]  ;;  %v366_v51 = vld [vmem:[%s2628_s8 + $0x198] sm:$0xff] }
  0x5e   : > { %972 = vmatpush1.bf16.msra.mxu1 %v2285_v19  ;;  %v459_v19 = vpack.c.bf16 %v351_v14, %v347_v13  ;;  %v472_v48 = vpack.c.bf16 %v376_v44, %v372_v43  ;;  %v371_v52 = vld [vmem:[%s2628_s8 + $0x1c0] sm:$0xff]  ;;  %v380_v55 = vld [vmem:[%s2628_s8 + $0x208] sm:$0xff]  ;;  %v465_v57 = vpack.c.bf16 %v361_v50, %v357_v49  ;;  %v369_v62 = vld [vmem:[%s2628_s8 + $0x1b0] sm:$0xff] }
  0x5f   : > { %973 = vmatprep.subr.bf16.mxu1 %v2499_v1  ;;  %2067 = vmatpush3.bf16.msra.mxu0 %v2293_v23  ;;  %v345_v23 = vld [vmem:[%s2628_s8 + $0xf0] sm:$0xff]  ;;  %v375_v53 = vld [vmem:[%s2628_s8 + $0x1e0] sm:$0xff]  ;;  %v384_v56 = vld [vmem:[%s2628_s8 + $0x228] sm:$0xff] }
  0x60   : > { %2068 = vmatprep.subr.bf16.mxu0 %v2295_v24  ;;  %v350_v24 = vld [vmem:[%s2628_s8 + $0x118] sm:$0xff]  ;;  %v379_v0 = vld [vmem:[%s2628_s8 + $0x200] sm:$0xff]  ;;  %v388_v3 = vld [vmem:[%s2628_s8 + $0x248] sm:$0xff] }
  0x61   : > { %v462_v34 = vpack.c.bf16 %v354_v25, %v350_v24  ;;  %v374_v63 = vld [vmem:[%s2628_s8 + $0x1d8] sm:$0xff]  ;;  %v392_v4 = vld [vmem:[%s2628_s8 + $0x268] sm:$0xff]  ;;  %v377_v10 = vld [vmem:[%s2628_s8 + $0x1f0] sm:$0xff] }
  0x62   : > { %974 = vmatpush1.bf16.msra.mxu1 %v2288_v22  ;;  %v341_v22 = vld [vmem:[%s2628_s8 + $0xd0] sm:$0xff]  ;;  %v382_v11 = vld [vmem:[%s2628_s8 + $0x218] sm:$0xff]  ;;  %v387_v12 = vld [vmem:[%s2628_s8 + $0x240] sm:$0xff] }
  0x63   : > { %975 = vmatprep.subr.bf16.mxu1 %v2499_v1  ;;  %2069 = vmatpush3.bf16.msra.mxu0 %v2296_v29  ;;  %v368_v29 = vld [vmem:[%s2628_s8 + $0x1a8] sm:$0xff]  ;;  %v457_v31 = vpack.c.bf16 %v345_v23, %v341_v22  ;;  %v391_v13 = vld [vmem:[%s2628_s8 + $0x260] sm:$0xff]  ;;  %v386_v14 = vld [vmem:[%s2628_s8 + $0x238] sm:$0xff] }
  0x64   : > { %v468_v35 = vpack.c.bf16 %v368_v29, %v364_v28  ;;  %2186 = vmatprep.subr.bf16.mxu0 %v2300_v30  ;;  %v396_v15 = vld [vmem:[%s2628_s8 + $0x288] sm:$0xff]  ;;  %v385_v22 = vld [vmem:[%s2628_s8 + $0x230] sm:$0xff]  ;;  %v390_v23 = vld [vmem:[%s2628_s8 + $0x258] sm:$0xff] }
  0x65   : > { %v400_v16 = vld [vmem:[%s2628_s8 + $0x2a8] sm:$0xff]  ;;  %v395_v24 = vld [vmem:[%s2628_s8 + $0x280] sm:$0xff]  ;;  %v410_v50 = vld [vmem:[%s2628_s8 + $0x2f8] sm:$0xff] }
  0x66   : > { %976 = vmatpush1.bf16.msra.mxu1 %v2291_v27  ;;  %831 = vmatmul.mubr.bf16.vlgmr.msra.gmra.mrb[0].mxu0 %v443_v37  ;;  %v359_v27 = vld [vmem:[%s2628_s8 + $0x160] sm:$0xff]  ;;  %v349_v37 = vld [vmem:[%s2628_s8 + $0x110] sm:$0xff]  ;;  %v408_v28 = vld [vmem:[%s2628_s8 + $0x2e8] sm:$0xff] }
  0x67   : > { %977 = vmatprep.subr.bf16.mxu1 %v2499_v1  ;;  %838 = vmatprep.mubr.bf16.mxu0 %v448_v39  ;;  %v463_v32 = vpack.c.bf16 %v359_v27, %v355_v26  ;;  %v358_v39 = vld [vmem:[%s2628_s8 + $0x158] sm:$0xff]  ;;  %v399_v25 = vld [vmem:[%s2628_s8 + $0x2a0] sm:$0xff]  ;;  %v404_v27 = vld [vmem:[%s2628_s8 + $0x2c8] sm:$0xff] }
  0x68   : > { %2187 = vmatpush3.bf16.msra.mxu0 %v2300_v30  ;;  %v394_v26 = vld [vmem:[%s2628_s8 + $0x278] sm:$0xff]  ;;  %v415_v49 = vld [vmem:[%s2628_s8 + $0x320] sm:$0xff] }
  0x69   : > { %2188 = vmatprep.subr.bf16.mxu0 %v2301_v33 }
  0x6a   : > { %978 = vmatpush1.bf16.msra.mxu1 %v2294_v38  ;;  %v353_v38 = vld [vmem:[%s2628_s8 + $0x130] sm:$0xff] }
  0x6b   : > { %979 = vmatprep.subr.bf16.mxu1 %v2499_v1 }
  0x6c   : > { %2189 = vmatpush3.bf16.msra.mxu0 %v2301_v33 }
  0x6d   : > { %2190 = vmatprep.subr.bf16.mxu0 %v2302_v36 }
  0x6e   : > { %980 = vmatpush1.bf16.msra.mxu1 %v2297_v40  ;;  %839 = vmatmul.mubr.bf16.gmra.mrb[4].mxu0 %v447_v45  ;;  %v363_v40 = vld [vmem:[%s2628_s8 + $0x180] sm:$0xff]  ;;  %v461_v45 = vpack.c.bf16 %v353_v38, %v349_v37  ;;  %v402_v38 = vld [vmem:[%s2628_s8 + $0x2b8] sm:$0xff] }
  0x6f   : > { %981 = vmatprep.subr.bf16.mxu1 %v2499_v1  ;;  %846 = vmatprep.mubr.bf16.mxu0 %v452_v47  ;;  %v466_v47 = vpack.c.bf16 %v362_v42, %v358_v39  ;;  %v407_v37 = vld [vmem:[%s2628_s8 + $0x2e0] sm:$0xff]  ;;  %v412_v39 = vld [vmem:[%s2628_s8 + $0x308] sm:$0xff] }
  0x70   : > { %2191 = vmatpush3.bf16.msra.mxu0 %v2302_v36 }
  0x72   : > { %982 = vmatpush1.bf16.msra.mxu1 %v2298_v46  ;;  %v467_v46 = vpack.c.bf16 %v367_v41, %v363_v40  ;;  %v416_v40 = vld [vmem:[%s2628_s8 + $0x328] sm:$0xff] }
  0x73   : > { %983 = vmatprep.subr.bf16.mxu1 %v2499_v1  ;;  %v339_v1 = vld [vmem:[%s2628_s8 + $0xc0] sm:$0xff]  ;;  %v492_v44 = vpack.c.bf16 %v416_v40, %v412_v39 }
  0x74   : > { %v455_v7 = vpack.c.bf16 %v343_v2, %v339_v1  ;;  %v383_v1 = vld [vmem:[%s2628_s8 + $0x220] sm:$0xff]  ;;  %v378_v2 = vld [vmem:[%s2628_s8 + $0x1f8] sm:$0xff] }
  0x76   : > { %984 = vmatpush1.bf16.msra.mxu1 %v796_v54  ;;  %847 = vmatmul.mubr.bf16.gmra.mrb[8].mxu0 %v451_v59  ;;  %v370_v54 = vld [vmem:[%s2628_s8 + $0x1b8] sm:$0xff] }
  0x77   : > { %854 = vmatprep.mubr.bf16.mxu0 %v456_v61  ;;  %2226 = vmatprep.subr.bf16.mxu1 %v2300_v30  ;;  %v470_v59 = vpack.c.bf16 %v370_v54, %v366_v51  ;;  %v365_v61 = vld [vmem:[%s2628_s8 + $0x190] sm:$0xff]  ;;  %v420_v51 = vld [vmem:[%s2628_s8 + $0x348] sm:$0xff] }
  0x78   : > { %v469_v5 = vpack.c.bf16 %v369_v62, %v365_v61  ;;  %v423_v61 = vld [vmem:[%s2628_s8 + $0x360] sm:$0xff]  ;;  %v418_v62 = vld [vmem:[%s2628_s8 + $0x338] sm:$0xff] }
  0x79   : > { %992 = vmatmul.mubr.bf16.vlgmr.msra.gmra.mrb[0].mxu1 %v445_v58  ;;  %v471_v58 = vpack.c.bf16 %v375_v53, %v371_v52  ;;  %v424_v52 = vld [vmem:[%s2628_s8 + $0x368] sm:$0xff] }
  0x7a   : > { %2011 = vmatprep.mubr.msk.bf16.mxu1 %vm745_vm0, %v450_v60  ;;  %2230 = vmatpush3.bf16.msra.mxu1 %v2300_v30  ;;  %v476_v60 = vpack.c.bf16 %v384_v56, %v380_v55  ;;  %v483_v30 = vpack.c.bf16 %v399_v25, %v395_v24  ;;  %v496_v56 = vpack.c.bf16 %v424_v52, %v420_v51 }
  0x7b   : > { %2227 = vmatprep.subr.bf16.mxu1 %v2301_v33 }
  0x7e   : > { %855 = vmatmul.mubr.bf16.gmra.mrb[12].mxu0 %v455_v7  ;;  %2231 = vmatpush3.bf16.msra.mxu1 %v2301_v33  ;;  %v474_v7 = vpack.c.bf16 %v378_v2, %v374_v63  ;;  %v389_v33 = vld [vmem:[%s2628_s8 + $0x250] sm:$0xff]  ;;  %v428_v63 = vld [vmem:[%s2628_s8 + $0x388] sm:$0xff] }
  0x7f   : > { %862 = vmatprep.mubr.bf16.mxu0 %v460_v9  ;;  %2228 = vmatprep.subr.bf16.mxu1 %v2302_v36  ;;  %v373_v9 = vld [vmem:[%s2628_s8 + $0x1d0] sm:$0xff] }
  0x80   : > { %v473_v17 = vpack.c.bf16 %v377_v10, %v373_v9  ;;  %v431_v9 = vld [vmem:[%s2628_s8 + $0x3a0] sm:$0xff]  ;;  %v426_v10 = vld [vmem:[%s2628_s8 + $0x378] sm:$0xff] }
  0x81   : > { %1000 = vmatmul.mubr.bf16.gmra.mrb[4].mxu1 %v449_v6  ;;  %v475_v6 = vpack.c.bf16 %v383_v1, %v379_v0  ;;  %v432_v0 = vld [vmem:[%s2628_s8 + $0x3a8] sm:$0xff] }
  0x82   : > { %2012 = vmatprep.mubr.msk.bf16.mxu1 %vm745_vm0, %v454_v8  ;;  %2232 = vmatpush3.bf16.msra.mxu1 %v2302_v36  ;;  %v480_v8 = vpack.c.bf16 %v392_v4, %v388_v3  ;;  %v403_v36 = vld [vmem:[%s2628_s8 + $0x2c0] sm:$0xff]  ;;  %v500_v4 = vpack.c.bf16 %v432_v0, %v428_v63 }
  0x83   : > { %v487_v42 = vpack.c.bf16 %v407_v37, %v403_v36 }
  0x86   : > { %863 = vmatmul.mubr.bf16.gmra.mrb[16].mxu0 %v459_v19  ;;  %v478_v19 = vpack.c.bf16 %v386_v14, %v382_v11  ;;  %v436_v11 = vld [vmem:[%s2628_s8 + $0x3c8] sm:$0xff] }
  0x87   : > { %870 = vmatprep.mubr.bf16.mxu0 %v464_v21  ;;  %v381_v21 = vld [vmem:[%s2628_s8 + $0x210] sm:$0xff] }
  0x88   : > { %v477_v29 = vpack.c.bf16 %v385_v22, %v381_v21  ;;  %v439_v21 = vld [vmem:[%s2628_s8 + $0x3e0] sm:$0xff]  ;;  %v430_v22 = vld [vmem:[%s2628_s8 + $0x398] sm:$0xff] }
  0x89   : > { %1008 = vmatmul.mubr.bf16.gmra.mrb[8].mxu1 %v453_v18  ;;  %v479_v18 = vpack.c.bf16 %v391_v13, %v387_v12  ;;  %v440_v12 = vld [vmem:[%s2628_s8 + $0x3e8] sm:$0xff] }
  0x8a   : > { %2013 = vmatprep.mubr.msk.bf16.mxu1 %vm745_vm0, %v458_v20  ;;  %v484_v20 = vpack.c.bf16 %v400_v16, %v396_v15  ;;  %v504_v16 = vpack.c.bf16 %v440_v12, %v436_v11 }
  0x8e   : > { %871 = vmatmul.mubr.bf16.gmra.mrb[20].mxu0 %v463_v32  ;;  %v488_v32 = vpack.c.bf16 %v408_v28, %v404_v27  ;;  %v429_v27 = vld [vmem:[%s2628_s8 + $0x390] sm:$0xff] }
  0x8f   : > { %878 = vmatprep.mubr.bf16.mxu0 %v468_v35  ;;  %v398_v35 = vld [vmem:[%s2628_s8 + $0x298] sm:$0xff]  ;;  %v433_v28 = vld [vmem:[%s2628_s8 + $0x3b0] sm:$0xff] }
  0x90   : > { %v486_v43 = vpack.c.bf16 %v402_v38, %v398_v35 }
  0x91   : > { %1016 = vmatmul.mubr.bf16.gmra.mrb[12].mxu1 %v457_v31  ;;  %v482_v31 = vpack.c.bf16 %v394_v26, %v390_v23  ;;  %v434_v23 = vld [vmem:[%s2628_s8 + $0x3b8] sm:$0xff] }
  0x92   : > { %2014 = vmatprep.mubr.msk.bf16.mxu1 %vm745_vm0, %v462_v34  ;;  %v393_v34 = vld [vmem:[%s2628_s8 + $0x270] sm:$0xff]  ;;  %v502_v26 = vpack.c.bf16 %v434_v23, %v430_v22 }
  0x93   : > { %v481_v41 = vpack.c.bf16 %v393_v34, %v389_v33  ;;  %v437_v33 = vld [vmem:[%s2628_s8 + $0x3d0] sm:$0xff] }
  0x94   : > { %v441_v34 = vld [vmem:[%s2628_s8 + $0x3f0] sm:$0xff] }
  0x95   : > { %v505_v35 = vpack.c.bf16 %v441_v34, %v437_v33 }
  0x96   : > { %879 = vmatmul.mubr.bf16.gmra.mrb[24].mxu0 %v467_v46  ;;  %v401_v46 = vld [vmem:[%s2628_s8 + $0x2b0] sm:$0xff] }
  0x97   : > { %886 = vmatprep.mubr.bf16.mxu0 %v472_v48  ;;  %v411_v48 = vld [vmem:[%s2628_s8 + $0x300] sm:$0xff] }
  0x98   : > { %v491_v54 = vpack.c.bf16 %v415_v49, %v411_v48 }
  0x99   : > { %1024 = vmatmul.mubr.bf16.gmra.mrb[16].mxu1 %v461_v45  ;;  %v397_v45 = vld [vmem:[%s2628_s8 + $0x290] sm:$0xff] }
  0x9a   : > { %2015 = vmatprep.mubr.msk.bf16.mxu1 %vm745_vm0, %v466_v47  ;;  %v406_v47 = vld [vmem:[%s2628_s8 + $0x2d8] sm:$0xff]  ;;  %v485_v53 = vpack.c.bf16 %v401_v46, %v397_v45 }
  0x9b   : > { %v490_v55 = vpack.c.bf16 %v410_v50, %v406_v47 }
  0x9e   : > { %887 = vmatmul.mubr.bf16.gmra.mrb[28].mxu0 %v471_v58  ;;  %v409_v58 = vld [vmem:[%s2628_s8 + $0x2f0] sm:$0xff] }
  0x9f   : > { %894 = vmatprep.mubr.bf16.mxu0 %v476_v60  ;;  %v419_v60 = vld [vmem:[%s2628_s8 + $0x340] sm:$0xff] }
  0xa0   : > { %v495_v2 = vpack.c.bf16 %v423_v61, %v419_v60 }
  0xa1   : > { %1032 = vmatmul.mubr.bf16.gmra.mrb[20].mxu1 %v465_v57  ;;  %v405_v57 = vld [vmem:[%s2628_s8 + $0x2d0] sm:$0xff] }
  0xa2   : > { %2016 = vmatprep.mubr.msk.bf16.mxu1 %vm745_vm0, %v470_v59  ;;  %v414_v59 = vld [vmem:[%s2628_s8 + $0x318] sm:$0xff]  ;;  %v489_v1 = vpack.c.bf16 %v409_v58, %v405_v57 }
  0xa3   : > { %v494_v3 = vpack.c.bf16 %v418_v62, %v414_v59 }
  0xa6   : > { %895 = vmatmul.mubr.bf16.gmra.mrb[32].mxu0 %v475_v6  ;;  %v417_v6 = vld [vmem:[%s2628_s8 + $0x330] sm:$0xff] }
  0xa7   : > { %902 = vmatprep.mubr.bf16.mxu0 %v480_v8  ;;  %v427_v8 = vld [vmem:[%s2628_s8 + $0x380] sm:$0xff] }
  0xa8   : > { %v499_v14 = vpack.c.bf16 %v431_v9, %v427_v8 }
  0xa9   : > { %1040 = vmatmul.mubr.bf16.gmra.mrb[24].mxu1 %v469_v5  ;;  %v413_v5 = vld [vmem:[%s2628_s8 + $0x310] sm:$0xff] }
  0xaa   : > { %2017 = vmatprep.mubr.msk.bf16.mxu1 %vm745_vm0, %v474_v7  ;;  %v422_v7 = vld [vmem:[%s2628_s8 + $0x358] sm:$0xff]  ;;  %v493_v13 = vpack.c.bf16 %v417_v6, %v413_v5 }
  0xab   : > { %v498_v15 = vpack.c.bf16 %v426_v10, %v422_v7 }
  0xae   : > { %903 = vmatmul.mubr.bf16.gmra.mrb[36].mxu0 %v479_v18  ;;  %v421_v18 = vld [vmem:[%s2628_s8 + $0x350] sm:$0xff] }
  0xaf   : > { %910 = vmatprep.mubr.bf16.mxu0 %v484_v20  ;;  %v435_v20 = vld [vmem:[%s2628_s8 + $0x3c0] sm:$0xff] }
  0xb0   : > { %v503_v25 = vpack.c.bf16 %v439_v21, %v435_v20 }
  0xb1   : > { %1048 = vmatmul.mubr.bf16.gmra.mrb[28].mxu1 %v473_v17  ;;  %v2303_v17 = vld [vmem:[%s3104_s3 + $0x18] sm:$0xff]  }
  0xb2   : > { %2018 = vmatprep.mubr.msk.bf16.mxu1 %vm745_vm0, %v478_v19  ;;  %v425_v19 = vld [vmem:[%s2628_s8 + $0x370] sm:$0xff]  ;;  %2192 = vmatprep.subr.bf16.mxu0 %v2303_v17 }
  0xb3   : > { %2229 = vmatprep.subr.bf16.mxu1 %v2303_v17  ;;  %2193 = vmatpush3.bf16.msra.mxu0 %v2303_v17  ;;  %v497_v24 = vpack.c.bf16 %v425_v19, %v421_v18 }
  0xb4   : > { %2233 = vmatpush3.bf16.msra.mxu1 %v2303_v17 }
  0xb6   : > { %911 = vmatmul.mubr.bf16.gmra.mrb[40].mxu0 %v483_v30  ;;  %v442_v30 = vld [vmem:[%s2628_s8 + $0x3f8] sm:$0xff] }
  0xb7   : > { %918 = vmatprep.mubr.bf16.mxu0 %v488_v32 }
  0xb9   : > { %1056 = vmatmul.mubr.bf16.gmra.mrb[32].mxu1 %v477_v29  ;;  %v438_v29 = vld [vmem:[%s2628_s8 + $0x3d8] sm:$0xff] }
  0xba   : > { %2019 = vmatprep.mubr.msk.bf16.mxu1 %vm745_vm0, %v482_v31  ;;  %v501_v31 = vpack.c.bf16 %v433_v28, %v429_v27  ;;  %v506_v32 = vpack.c.bf16 %v442_v30, %v438_v29 }
  0xbe   : > { %919 = vmatmul.mubr.bf16.gmra.mrb[44].mxu0 %v487_v42 }
  0xbf   : > { %926 = vmatprep.mubr.bf16.mxu0 %v492_v44  ;;  %v2893_v44 = vld [vmem:[%s3103_s2] ss:$0 sm:$0xff] }
  0xc1   : > { %1064 = vmatmul.mubr.bf16.gmra.mrb[36].mxu1 %v481_v41 }
  0xc2   : > { %2020 = vmatprep.mubr.msk.bf16.mxu1 %vm745_vm0, %v486_v43 }
  0xc6   : > { %927 = vmatmul.mubr.bf16.gmra.mrb[48].mxu0 %v491_v54 }
  0xc7   : > { %934 = vmatprep.mubr.bf16.mxu0 %v496_v56 }
  0xc9   : > { %1072 = vmatmul.mubr.bf16.gmra.mrb[40].mxu1 %v485_v53 }
  0xca   : > { %2021 = vmatprep.mubr.msk.bf16.mxu1 %vm745_vm0, %v490_v55 }
  0xce   : > { %935 = vmatmul.mubr.bf16.gmra.mrb[52].mxu0 %v495_v2 }
  0xcf   : > { %942 = vmatprep.mubr.bf16.mxu0 %v500_v4 }
  0xd1   : > { %1080 = vmatmul.mubr.bf16.gmra.mrb[44].mxu1 %v489_v1 }
  0xd2   : > { %2022 = vmatprep.mubr.msk.bf16.mxu1 %vm745_vm0, %v494_v3 }
  0xd6   : > { %943 = vmatmul.mubr.bf16.gmra.mrb[56].mxu0 %v499_v14 }
  0xd7   : > { %950 = vmatprep.mubr.bf16.mxu0 %v504_v16 }
  0xd9   : > { %1088 = vmatmul.mubr.bf16.gmra.mrb[48].mxu1 %v493_v13 }
  0xda   : > { %2023 = vmatprep.mubr.msk.bf16.mxu1 %vm745_vm0, %v498_v15 }
  0xde   : > { %951 = vmatmul.mubr.bf16.gmra.mrb[60].mxu0 %v503_v25 }
  0xe1   : > { %1096 = vmatmul.mubr.bf16.gmra.mrb[52].mxu1 %v497_v24 }
  0xe2   : > { %2024 = vmatprep.mubr.msk.bf16.mxu1 %vm745_vm0, %v502_v26 }
  0xe9   : > { %1104 = vmatmul.mubr.bf16.gmra.mrb[56].mxu1 %v501_v31 }
  0xea   : > { %2025 = vmatprep.mubr.msk.bf16.mxu1 %vm745_vm0, %v506_v32 }
  0xf1   : > { %1112 = vmatmul.mubr.bf16.gmra.mrb[60].mxu1 %v505_v35 }
 0x139   : > { %v2070_v36 = vpop.f32.mrb[0].mxu0 }
 0x13a   : > { %v2071_v37 = vpop.f32.mrb[1].mxu0 }
 0x13b   : > { %v2072_v38 = vadd.f32 %v2071_v37, %v2070_v36  ;;  %v2073_v39 = vpop.f32.mrb[2].mxu0 }
 0x13c   : > { %v2074_v40 = vpop.f32.mrb[3].mxu0 }
 0x13d   : > { %v2075_v41 = vadd.f32 %v2074_v40, %v2073_v39  ;;  %v833_v49 = vadd.f32 %v2072_v38, %v2893_v44 }
 0x13f   : > { %v836_v54 = vadd.f32 %v2075_v41, %v2893_v44 }
 0x141   : > { %v2076_v42 = vpop.f32.mrb[4].mxu0 }
 0x142   : > { %v2077_v43 = vpop.f32.mrb[5].mxu0 }
 0x143   : > { %v2078_v45 = vadd.f32 %v2077_v43, %v2076_v42  ;;  %v2079_v46 = vpop.f32.mrb[6].mxu0 }
 0x144   : > { %v2080_v47 = vpop.f32.mrb[7].mxu0 }
 0x145   : > { %v2081_v48 = vadd.f32 %v2080_v47, %v2079_v46  ;;  %v841_v1 = vadd.f32 %v2078_v45, %v2893_v44 }
 0x147   : > { %v844_v7 = vadd.f32 %v2081_v48, %v2893_v44 }
 0x149   : > { %v2082_v51 = vpop.f32.mrb[8].mxu0 }
 0x14a   : > { %v2083_v55 = vpop.f32.mrb[9].mxu0 }
 0x14b   : > { %v2084_v57 = vadd.f32 %v2083_v55, %v2082_v51  ;;  %v2085_v58 = vpop.f32.mrb[10].mxu0 }
 0x14c   : > { %v993_v50 = vpop.f32.mrb[0].mxu1  ;;  %v2086_v61 = vpop.f32.mrb[11].mxu0 }
 0x14d   : > { %v994_v52 = vadd.f32 %v993_v50, %v833_v49  ;;  %v995_v53 = vpop.f32.mrb[1].mxu1  ;;  %v2087_v62 = vadd.f32 %v2086_v61, %v2085_v58  ;;  %v849_v18 = vadd.f32 %v2084_v57, %v2893_v44 }
 0x14e   : > { %v996_v56 = vpop.f32.mrb[2].mxu1 }
 0x14f   : > { %v997_v59 = vadd.f32 %v996_v56, %v836_v54  ;;  %v998_v60 = vpop.f32.mrb[3].mxu1  ;;  %v1120_v63 = vmax.f32 %v994_v52, 0.0  ;;  %v852_v24 = vadd.f32 %v2087_v62, %v2893_v44 }
 0x151   : > { %v1121_v0 = vmax.f32 %v997_v59, 0.0  ;;  %v2088_v4 = vpop.f32.mrb[12].mxu0 }
 0x152   : > { %v2089_v8 = vpop.f32.mrb[13].mxu0 }
 0x153   : > { %v1152_v2 = vpack.c.bf16 %v1121_v0, %v1120_v63  ;;  %v2090_v10 = vadd.f32 %v2089_v8, %v2088_v4  ;;  %v2091_v11 = vpop.f32.mrb[14].mxu0 }
 0x154   : > { %v1001_v3 = vpop.f32.mrb[4].mxu1  ;;  %v2092_v14 = vpop.f32.mrb[15].mxu0 }
 0x155   : > { %v1002_v5 = vadd.f32 %v1001_v3, %v841_v1  ;;  %v1003_v6 = vpop.f32.mrb[5].mxu1  ;;  %2194 = vmatprep.mubr.msk.bf16.mxu0 %vm1207_vm2, %v1152_v2  ;;  %v2093_v15 = vadd.f32 %v2092_v14, %v2091_v11  ;;  %v857_v35 = vadd.f32 %v2090_v10, %v2893_v44 }
 0x156   : > { %v1004_v9 = vpop.f32.mrb[6].mxu1 }
 0x157   : > { %v1005_v12 = vadd.f32 %v1004_v9, %v844_v7  ;;  %v1006_v13 = vpop.f32.mrb[7].mxu1  ;;  %v1122_v16 = vmax.f32 %v1002_v5, 0.0  ;;  %v860_v41 = vadd.f32 %v2093_v15, %v2893_v44 }
 0x159   : > { %v1123_v17 = vmax.f32 %v1005_v12, 0.0  ;;  %v2094_v21 = vpop.f32.mrb[16].mxu0 }
 0x15a   : > { %v2095_v25 = vpop.f32.mrb[17].mxu0 }
 0x15b   : > { %v1153_v19 = vpack.c.bf16 %v1123_v17, %v1122_v16  ;;  %v2096_v27 = vadd.f32 %v2095_v25, %v2094_v21  ;;  %v2097_v28 = vpop.f32.mrb[18].mxu0 }
 0x15c   : > { %v1009_v20 = vpop.f32.mrb[8].mxu1  ;;  %v2098_v31 = vpop.f32.mrb[19].mxu0 }
 0x15d   : > { %v1010_v22 = vadd.f32 %v1009_v20, %v849_v18  ;;  %v1011_v23 = vpop.f32.mrb[9].mxu1  ;;  %2195 = vmatmul.mubr.msk.bf16.vlgmr.msra.gmra.mrb[64].mxu0 %vm1207_vm2, %v1153_v19  ;;  %v2099_v32 = vadd.f32 %v2098_v31, %v2097_v28  ;;  %v865_v53 = vadd.f32 %v2096_v27, %v2893_v44 }
 0x15e   : > { %v1012_v26 = vpop.f32.mrb[10].mxu1 }
 0x15f   : > { %v1013_v29 = vadd.f32 %v1012_v26, %v852_v24  ;;  %v1014_v30 = vpop.f32.mrb[11].mxu1  ;;  %v1124_v33 = vmax.f32 %v1010_v22, 0.0  ;;  %v868_v59 = vadd.f32 %v2099_v32, %v2893_v44 }
 0x161   : > { %v1125_v34 = vmax.f32 %v1013_v29, 0.0  ;;  %v2100_v38 = vpop.f32.mrb[20].mxu0 }
 0x162   : > { %v2101_v42 = vpop.f32.mrb[21].mxu0 }
 0x163   : > { %v1154_v36 = vpack.c.bf16 %v1125_v34, %v1124_v33  ;;  %v2102_v45 = vadd.f32 %v2101_v42, %v2100_v38  ;;  %v2103_v46 = vpop.f32.mrb[22].mxu0 }
 0x164   : > { %v1017_v37 = vpop.f32.mrb[12].mxu1  ;;  %v2104_v49 = vpop.f32.mrb[23].mxu0 }
 0x165   : > { %v1018_v39 = vadd.f32 %v1017_v37, %v857_v35  ;;  %v1019_v40 = vpop.f32.mrb[13].mxu1  ;;  %2198 = vmatprep.mubr.msk.bf16.mxu0 %vm1207_vm2, %v1154_v36  ;;  %v2105_v50 = vadd.f32 %v2104_v49, %v2103_v46  ;;  %v873_v6 = vadd.f32 %v2102_v45, %v2893_v44 }
 0x166   : > { %v1020_v43 = vpop.f32.mrb[14].mxu1 }
 0x167   : > { %v1021_v47 = vadd.f32 %v1020_v43, %v860_v41  ;;  %v1022_v48 = vpop.f32.mrb[15].mxu1  ;;  %v1126_v51 = vmax.f32 %v1018_v39, 0.0  ;;  %v876_v12 = vadd.f32 %v2105_v50, %v2893_v44 }
 0x169   : > { %v1127_v52 = vmax.f32 %v1021_v47, 0.0  ;;  %v2106_v56 = vpop.f32.mrb[24].mxu0 }
 0x16a   : > { %v2107_v60 = vpop.f32.mrb[25].mxu0 }
 0x16b   : > { %v1155_v54 = vpack.c.bf16 %v1127_v52, %v1126_v51  ;;  %v2108_v62 = vadd.f32 %v2107_v60, %v2106_v56  ;;  %v2109_v63 = vpop.f32.mrb[26].mxu0 }
 0x16c   : > { %v1025_v55 = vpop.f32.mrb[16].mxu1  ;;  %v2110_v2 = vpop.f32.mrb[27].mxu0 }
 0x16d   : > { %v1026_v57 = vadd.f32 %v1025_v55, %v865_v53  ;;  %v1027_v58 = vpop.f32.mrb[17].mxu1  ;;  %2199 = vmatmul.mubr.msk.bf16.gmra.mrb[68].mxu0 %vm1207_vm2, %v1155_v54  ;;  %v2111_v3 = vadd.f32 %v2110_v2, %v2109_v63  ;;  %v881_v23 = vadd.f32 %v2108_v62, %v2893_v44 }
 0x16e   : > { %v1028_v61 = vpop.f32.mrb[18].mxu1 }
 0x16f   : > { %v1029_v0 = vadd.f32 %v1028_v61, %v868_v59  ;;  %v1030_v1 = vpop.f32.mrb[19].mxu1  ;;  %v1128_v4 = vmax.f32 %v1026_v57, 0.0  ;;  %v884_v29 = vadd.f32 %v2111_v3, %v2893_v44 }
 0x171   : > { %v1129_v5 = vmax.f32 %v1029_v0, 0.0  ;;  %v2112_v9 = vpop.f32.mrb[28].mxu0 }
 0x172   : > { %v2113_v13 = vpop.f32.mrb[29].mxu0 }
 0x173   : > { %v1156_v7 = vpack.c.bf16 %v1129_v5, %v1128_v4  ;;  %v2114_v15 = vadd.f32 %v2113_v13, %v2112_v9  ;;  %v2115_v16 = vpop.f32.mrb[30].mxu0 }
 0x174   : > { %v1033_v8 = vpop.f32.mrb[20].mxu1  ;;  %v2116_v19 = vpop.f32.mrb[31].mxu0 }
 0x175   : > { %v1034_v10 = vadd.f32 %v1033_v8, %v873_v6  ;;  %v1035_v11 = vpop.f32.mrb[21].mxu1  ;;  %2202 = vmatprep.mubr.msk.bf16.mxu0 %vm1207_vm2, %v1156_v7  ;;  %v2117_v20 = vadd.f32 %v2116_v19, %v2115_v16  ;;  %v889_v40 = vadd.f32 %v2114_v15, %v2893_v44 }
 0x176   : > { %v1036_v14 = vpop.f32.mrb[22].mxu1 }
 0x177   : > { %v1037_v17 = vadd.f32 %v1036_v14, %v876_v12  ;;  %v1038_v18 = vpop.f32.mrb[23].mxu1  ;;  %v1130_v21 = vmax.f32 %v1034_v10, 0.0  ;;  %v892_v47 = vadd.f32 %v2117_v20, %v2893_v44 }
 0x179   : > { %v1131_v22 = vmax.f32 %v1037_v17, 0.0  ;;  %v2118_v26 = vpop.f32.mrb[32].mxu0 }
 0x17a   : > { %v2119_v30 = vpop.f32.mrb[33].mxu0 }
 0x17b   : > { %v1157_v24 = vpack.c.bf16 %v1131_v22, %v1130_v21  ;;  %v2120_v32 = vadd.f32 %v2119_v30, %v2118_v26  ;;  %v2121_v33 = vpop.f32.mrb[34].mxu0 }
 0x17c   : > { %v1041_v25 = vpop.f32.mrb[24].mxu1  ;;  %v2122_v36 = vpop.f32.mrb[35].mxu0 }
 0x17d   : > { %v1042_v27 = vadd.f32 %v1041_v25, %v881_v23  ;;  %v1043_v28 = vpop.f32.mrb[25].mxu1  ;;  %2203 = vmatmul.mubr.msk.bf16.gmra.mrb[72].mxu0 %vm1207_vm2, %v1157_v24  ;;  %v2123_v37 = vadd.f32 %v2122_v36, %v2121_v33  ;;  %v897_v58 = vadd.f32 %v2120_v32, %v2893_v44 }
 0x17e   : > { %v1044_v31 = vpop.f32.mrb[26].mxu1 }
 0x17f   : > { %v1045_v34 = vadd.f32 %v1044_v31, %v884_v29  ;;  %v1046_v35 = vpop.f32.mrb[27].mxu1  ;;  %v1132_v38 = vmax.f32 %v1042_v27, 0.0  ;;  %v900_v0 = vadd.f32 %v2123_v37, %v2893_v44 }
 0x181   : > { %v1133_v39 = vmax.f32 %v1045_v34, 0.0  ;;  %v2124_v43 = vpop.f32.mrb[36].mxu0 }
 0x182   : > { %v2125_v48 = vpop.f32.mrb[37].mxu0 }
 0x183   : > { %v1158_v41 = vpack.c.bf16 %v1133_v39, %v1132_v38  ;;  %v2126_v50 = vadd.f32 %v2125_v48, %v2124_v43  ;;  %v2127_v51 = vpop.f32.mrb[38].mxu0 }
 0x184   : > { %v1049_v42 = vpop.f32.mrb[28].mxu1  ;;  %v2128_v54 = vpop.f32.mrb[39].mxu0 }
 0x185   : > { %v1050_v45 = vadd.f32 %v1049_v42, %v889_v40  ;;  %v1051_v46 = vpop.f32.mrb[29].mxu1  ;;  %2206 = vmatprep.mubr.msk.bf16.mxu0 %vm1207_vm2, %v1158_v41  ;;  %v2129_v55 = vadd.f32 %v2128_v54, %v2127_v51  ;;  %v905_v11 = vadd.f32 %v2126_v50, %v2893_v44 }
 0x186   : > { %v1052_v49 = vpop.f32.mrb[30].mxu1 }
 0x187   : > { %v1053_v52 = vadd.f32 %v1052_v49, %v892_v47  ;;  %v1054_v53 = vpop.f32.mrb[31].mxu1  ;;  %v1134_v56 = vmax.f32 %v1050_v45, 0.0  ;;  %v908_v17 = vadd.f32 %v2129_v55, %v2893_v44 }
 0x189   : > { %v1135_v57 = vmax.f32 %v1053_v52, 0.0  ;;  %v2130_v61 = vpop.f32.mrb[40].mxu0 }
 0x18a   : > { %v2131_v1 = vpop.f32.mrb[41].mxu0 }
 0x18b   : > { %v1159_v59 = vpack.c.bf16 %v1135_v57, %v1134_v56  ;;  %v2132_v3 = vadd.f32 %v2131_v1, %v2130_v61  ;;  %v2133_v4 = vpop.f32.mrb[42].mxu0 }
 0x18c   : > { %v1057_v60 = vpop.f32.mrb[32].mxu1  ;;  %v2134_v7 = vpop.f32.mrb[43].mxu0 }
 0x18d   : > { %v1058_v62 = vadd.f32 %v1057_v60, %v897_v58  ;;  %v1059_v63 = vpop.f32.mrb[33].mxu1  ;;  %2207 = vmatmul.mubr.msk.bf16.gmra.mrb[76].mxu0 %vm1207_vm2, %v1159_v59  ;;  %v2135_v8 = vadd.f32 %v2134_v7, %v2133_v4  ;;  %v913_v28 = vadd.f32 %v2132_v3, %v2893_v44 }
 0x18e   : > { %v1060_v2 = vpop.f32.mrb[34].mxu1 }
 0x18f   : > { %v1061_v5 = vadd.f32 %v1060_v2, %v900_v0  ;;  %v1062_v6 = vpop.f32.mrb[35].mxu1  ;;  %v1136_v9 = vmax.f32 %v1058_v62, 0.0  ;;  %v916_v34 = vadd.f32 %v2135_v8, %v2893_v44 }
 0x191   : > { %v1137_v10 = vmax.f32 %v1061_v5, 0.0  ;;  %v2136_v14 = vpop.f32.mrb[44].mxu0 }
 0x192   : > { %v2137_v18 = vpop.f32.mrb[45].mxu0 }
 0x193   : > { %v1160_v12 = vpack.c.bf16 %v1137_v10, %v1136_v9  ;;  %v2138_v20 = vadd.f32 %v2137_v18, %v2136_v14  ;;  %v2139_v21 = vpop.f32.mrb[46].mxu0 }
 0x194   : > { %v1065_v13 = vpop.f32.mrb[36].mxu1  ;;  %v2140_v24 = vpop.f32.mrb[47].mxu0 }
 0x195   : > { %v1066_v15 = vadd.f32 %v1065_v13, %v905_v11  ;;  %v1067_v16 = vpop.f32.mrb[37].mxu1  ;;  %2210 = vmatprep.mubr.msk.bf16.mxu0 %vm1207_vm2, %v1160_v12  ;;  %v2141_v25 = vadd.f32 %v2140_v24, %v2139_v21  ;;  %v921_v46 = vadd.f32 %v2138_v20, %v2893_v44 }
 0x196   : > { %v1068_v19 = vpop.f32.mrb[38].mxu1 }
 0x197   : > { %v1069_v22 = vadd.f32 %v1068_v19, %v908_v17  ;;  %v1070_v23 = vpop.f32.mrb[39].mxu1  ;;  %v1138_v26 = vmax.f32 %v1066_v15, 0.0  ;;  %v924_v52 = vadd.f32 %v2141_v25, %v2893_v44 }
 0x199   : > { %v1139_v27 = vmax.f32 %v1069_v22, 0.0  ;;  %v2142_v31 = vpop.f32.mrb[48].mxu0 }
 0x19a   : > { %v2143_v35 = vpop.f32.mrb[49].mxu0 }
 0x19b   : > { %v1161_v29 = vpack.c.bf16 %v1139_v27, %v1138_v26  ;;  %v2144_v37 = vadd.f32 %v2143_v35, %v2142_v31  ;;  %v2145_v38 = vpop.f32.mrb[50].mxu0 }
 0x19c   : > { %v1073_v30 = vpop.f32.mrb[40].mxu1  ;;  %v2146_v41 = vpop.f32.mrb[51].mxu0 }
 0x19d   : > { %v1074_v32 = vadd.f32 %v1073_v30, %v913_v28  ;;  %v1075_v33 = vpop.f32.mrb[41].mxu1  ;;  %2211 = vmatmul.mubr.msk.bf16.gmra.mrb[80].mxu0 %vm1207_vm2, %v1161_v29  ;;  %v2147_v42 = vadd.f32 %v2146_v41, %v2145_v38  ;;  %v929_v63 = vadd.f32 %v2144_v37, %v2893_v44 }
 0x19e   : > { %v1076_v36 = vpop.f32.mrb[42].mxu1 }
 0x19f   : > { %v1077_v39 = vadd.f32 %v1076_v36, %v916_v34  ;;  %v1078_v40 = vpop.f32.mrb[43].mxu1  ;;  %v1140_v43 = vmax.f32 %v1074_v32, 0.0  ;;  %v932_v5 = vadd.f32 %v2147_v42, %v2893_v44 }
 0x1a1   : > { %v1141_v45 = vmax.f32 %v1077_v39, 0.0  ;;  %v2148_v49 = vpop.f32.mrb[52].mxu0 }
 0x1a2   : > { %v2149_v53 = vpop.f32.mrb[53].mxu0 }
 0x1a3   : > { %v1162_v47 = vpack.c.bf16 %v1141_v45, %v1140_v43  ;;  %v2150_v55 = vadd.f32 %v2149_v53, %v2148_v49  ;;  %v2151_v56 = vpop.f32.mrb[54].mxu0 }
 0x1a4   : > { %v1081_v48 = vpop.f32.mrb[44].mxu1  ;;  %v2152_v59 = vpop.f32.mrb[55].mxu0 }
 0x1a5   : > { %v1082_v50 = vadd.f32 %v1081_v48, %v921_v46  ;;  %v1083_v51 = vpop.f32.mrb[45].mxu1  ;;  %2214 = vmatprep.mubr.msk.bf16.mxu0 %vm1207_vm2, %v1162_v47  ;;  %v2153_v60 = vadd.f32 %v2152_v59, %v2151_v56  ;;  %v937_v16 = vadd.f32 %v2150_v55, %v2893_v44 }
 0x1a6   : > { %v1084_v54 = vpop.f32.mrb[46].mxu1 }
 0x1a7   : > { %v1085_v57 = vadd.f32 %v1084_v54, %v924_v52  ;;  %v1086_v58 = vpop.f32.mrb[47].mxu1  ;;  %v1142_v61 = vmax.f32 %v1082_v50, 0.0  ;;  %v940_v22 = vadd.f32 %v2153_v60, %v2893_v44 }
 0x1a9   : > { %v1143_v62 = vmax.f32 %v1085_v57, 0.0  ;;  %v2154_v2 = vpop.f32.mrb[56].mxu0  ;;  %v2946_v57 = vld [vmem:[%s3105_s4] ss:$0 sm:$0xff] }
 0x1aa   : > { %v2155_v6 = vpop.f32.mrb[57].mxu0 }
 0x1ab   : > { %v1163_v0 = vpack.c.bf16 %v1143_v62, %v1142_v61  ;;  %v2156_v8 = vadd.f32 %v2155_v6, %v2154_v2  ;;  %v2157_v9 = vpop.f32.mrb[58].mxu0  ;;  %v2953_v62 = vld [vmem:[%s3106_s5] ss:$0 sm:$0xff] }
 0x1ac   : > { %v1089_v1 = vpop.f32.mrb[48].mxu1  ;;  %v2158_v12 = vpop.f32.mrb[59].mxu0 }
 0x1ad   : > { %v1090_v3 = vadd.f32 %v1089_v1, %v929_v63  ;;  %v1091_v4 = vpop.f32.mrb[49].mxu1  ;;  %2215 = vmatmul.mubr.msk.bf16.gmra.mrb[84].mxu0 %vm1207_vm2, %v1163_v0  ;;  %v2159_v13 = vadd.f32 %v2158_v12, %v2157_v9  ;;  %v945_v33 = vadd.f32 %v2156_v8, %v2893_v44 }
 0x1ae   : > { %v1092_v7 = vpop.f32.mrb[50].mxu1 }
 0x1af   : > { %v1093_v10 = vadd.f32 %v1092_v7, %v932_v5  ;;  %v1094_v11 = vpop.f32.mrb[51].mxu1  ;;  %v1144_v14 = vmax.f32 %v1090_v3, 0.0  ;;  %v948_v38 = vadd.f32 %v2159_v13, %v2893_v44 }
 0x1b1   : > { %v1145_v15 = vmax.f32 %v1093_v10, 0.0  ;;  %v2160_v19 = vpop.f32.mrb[60].mxu0 }
 0x1b2   : > { %v2161_v23 = vpop.f32.mrb[61].mxu0 }
 0x1b3   : > { %v1164_v17 = vpack.c.bf16 %v1145_v15, %v1144_v14  ;;  %v2162_v25 = vadd.f32 %v2161_v23, %v2160_v19  ;;  %v2163_v26 = vpop.f32.mrb[62].mxu0 }
 0x1b4   : > { %v1097_v18 = vpop.f32.mrb[52].mxu1  ;;  %v2164_v29 = vpop.f32.mrb[63].mxu0 }
 0x1b5   : > { %v1098_v20 = vadd.f32 %v1097_v18, %v937_v16  ;;  %v1099_v21 = vpop.f32.mrb[53].mxu1  ;;  %2218 = vmatprep.mubr.msk.bf16.mxu1 %vm1207_vm2, %v1164_v17  ;;  %v2165_v30 = vadd.f32 %v2164_v29, %v2163_v26  ;;  %v953_v45 = vadd.f32 %v2162_v25, %v2893_v44 }
 0x1b6   : > { %v1100_v24 = vpop.f32.mrb[54].mxu1 }
 0x1b7   : > { %v1101_v27 = vadd.f32 %v1100_v24, %v940_v22  ;;  %v1102_v28 = vpop.f32.mrb[55].mxu1  ;;  %v1146_v31 = vmax.f32 %v1098_v20, 0.0  ;;  %v956_v50 = vadd.f32 %v2165_v30, %v2893_v44 }
 0x1b9   : > { %v1147_v32 = vmax.f32 %v1101_v27, 0.0 }
 0x1bb   : > { %v1165_v34 = vpack.c.bf16 %v1147_v32, %v1146_v31 }
 0x1bc   : > { %v1105_v35 = vpop.f32.mrb[56].mxu1 }
 0x1bd   : > { %v1106_v36 = vadd.f32 %v1105_v35, %v945_v33  ;;  %v1107_v37 = vpop.f32.mrb[57].mxu1  ;;  %2219 = vmatmul.mubr.msk.bf16.vlgmr.msra.gmra.mrb[64].mxu1 %vm1207_vm2, %v1165_v34 }
 0x1be   : > { %v1108_v39 = vpop.f32.mrb[58].mxu1 }
 0x1bf   : > { %v1109_v40 = vadd.f32 %v1108_v39, %v948_v38  ;;  %v1110_v41 = vpop.f32.mrb[59].mxu1  ;;  %v1148_v42 = vmax.f32 %v1106_v36, 0.0 }
 0x1c1   : > { %v1149_v43 = vmax.f32 %v1109_v40, 0.0 }
 0x1c3   : > { %v1166_v46 = vpack.c.bf16 %v1149_v43, %v1148_v42 }
 0x1c4   : > { %v1113_v47 = vpop.f32.mrb[60].mxu1 }
 0x1c5   : > { %v1114_v48 = vadd.f32 %v1113_v47, %v953_v45  ;;  %v1115_v49 = vpop.f32.mrb[61].mxu1  ;;  %2222 = vmatprep.mubr.msk.bf16.mxu1 %vm1207_vm2, %v1166_v46 }
 0x1c6   : > { %v1116_v51 = vpop.f32.mrb[62].mxu1 }
 0x1c7   : > { %v1117_v52 = vadd.f32 %v1116_v51, %v956_v50  ;;  %v1118_v53 = vpop.f32.mrb[63].mxu1  ;;  %v1150_v54 = vmax.f32 %v1114_v48, 0.0 }
 0x1c9   : > { %v1151_v55 = vmax.f32 %v1117_v52, 0.0 }
 0x1cb   : > { %v1167_v56 = vpack.c.bf16 %v1151_v55, %v1150_v54 }
 0x1cd   : > { %2223 = vmatmul.mubr.msk.bf16.gmra.mrb[68].mxu1 %vm1207_vm2, %v1167_v56 }
 0x230   : > { %v2196_v58 = vpop.f32.mrb[64].mxu0 }
 0x231   : > { %v1299_v59 = vadd.f32 %v2196_v58, %v2946_v57  ;;  %v1290_v60 = vpop.f32.mrb[65].mxu0 }
 0x232   : > { %v1291_v61 = vadd.f32 %v2946_v57, %v1290_v60  ;;  %v2197_v44 = vpop.f32.mrb[66].mxu0 }
 0x233   : > { %v1419_v63 = vmax.f32 %v1299_v59, 0.0  ;;  %v1302_v0 = vadd.f32 %v2197_v44, %v2946_v57  ;;  %v1293_v1 = vpop.f32.mrb[67].mxu0 }
 0x234   : > { %v1417_v2 = vmax.f32 %v1291_v61, 0.0  ;;  %v1294_v3 = vadd.f32 %v2946_v57, %v1293_v1 }
 0x235   : > { %v1458_v4 = vmul.f32 %v2953_v62, %v1419_v63  ;;  %v1420_v6 = vmax.f32 %v1302_v0, 0.0 }
 0x236   : > { %v1418_v5 = vmax.f32 %v1294_v3, 0.0  ;;  %v1456_v8 = vmul.f32 %v2953_v62, %v1417_v2 }
 0x237   : > { %v1495_v7 = vsel %vm1488_vm3, %v1458_v4, 0.0  ;;  %v1459_v12 = vmul.f32 %v2953_v62, %v1420_v6 }
 0x238   : > { %1496 = vadd.xlane.f32.xlu0 %v1495_v7  ;;  %v1457_v9 = vmul.f32 %v2953_v62, %v1418_v5  ;;  %v1489_v11 = vsel %vm1488_vm3, %v1456_v8, 0.0 }
 0x239   : > { %v1498_v13 = vsel %vm1488_vm3, %v1459_v12, 0.0 }
 0x23a   : > { %v1492_v10 = vsel %vm1488_vm3, %v1457_v9, 0.0 }
 0x23b   : > { %1493 = vadd.xlane.f32.xlu1 %v1492_v10 }
 0x23c   : > { %1490 = vadd.xlane.f32.xlu0 %v1489_v11 }
 0x240   : > { %v2200_v14 = vpop.f32.mrb[68].mxu0  ;;  %1499 = vadd.xlane.f32.xlu0 %v1498_v13 }
 0x241   : > { %v1315_v15 = vadd.f32 %v2200_v14, %v2946_v57  ;;  %v1306_v16 = vpop.f32.mrb[69].mxu0 }
 0x242   : > { %v1307_v17 = vadd.f32 %v2946_v57, %v1306_v16  ;;  %v2201_v18 = vpop.f32.mrb[70].mxu0 }
 0x243   : > { %v1423_v19 = vmax.f32 %v1315_v15, 0.0  ;;  %v1318_v20 = vadd.f32 %v2201_v18, %v2946_v57  ;;  %v1309_v21 = vpop.f32.mrb[71].mxu0 }
 0x244   : > { %v1421_v22 = vmax.f32 %v1307_v17, 0.0  ;;  %v1310_v25 = vadd.f32 %v2946_v57, %v1309_v21 }
 0x245   : > { %v1462_v23 = vmul.f32 %v2953_v62, %v1423_v19  ;;  %v1424_v24 = vmax.f32 %v1318_v20, 0.0 }
 0x246   : > { %v1460_v27 = vmul.f32 %v2953_v62, %v1421_v22  ;;  %v1422_v28 = vmax.f32 %v1310_v25, 0.0 }
 0x247   : > { %v1507_v26 = vsel %vm1488_vm3, %v1462_v23, 0.0  ;;  %v1463_v30 = vmul.f32 %v2953_v62, %v1424_v24 }
 0x248   : > { %1508 = vadd.xlane.f32.xlu0 %v1507_v26  ;;  %v1501_v29 = vsel %vm1488_vm3, %v1460_v27, 0.0  ;;  %v1461_v32 = vmul.f32 %v2953_v62, %v1422_v28 }
 0x249   : > { %v1510_v31 = vsel %vm1488_vm3, %v1463_v30, 0.0 }
 0x24a   : > { %v1504_v38 = vsel %vm1488_vm3, %v1461_v32, 0.0 }
 0x24c   : > { %1502 = vadd.xlane.f32.xlu0 %v1501_v29 }
 0x250   : > { %v2204_v33 = vpop.f32.mrb[72].mxu0  ;;  %1511 = vadd.xlane.f32.xlu0 %v1510_v31 }
 0x251   : > { %v1322_v34 = vpop.f32.mrb[73].mxu0  ;;  %v1331_v56 = vadd.f32 %v2204_v33, %v2946_v57 }
 0x252   : > { %v1323_v35 = vadd.f32 %v2946_v57, %v1322_v34  ;;  %v2205_v36 = vpop.f32.mrb[74].mxu0 }
 0x253   : > { %v1325_v37 = vpop.f32.mrb[75].mxu0  ;;  %v1334_v0 = vadd.f32 %v2205_v36, %v2946_v57  ;;  %v1427_v4 = vmax.f32 %v1331_v56, 0.0 }
 0x254   : > { %v1425_v39 = vmax.f32 %v1323_v35, 0.0  ;;  %1505 = vadd.xlane.f32.xlu0 %v1504_v38  ;;  %v1326_v47 = vadd.f32 %v2946_v57, %v1325_v37 }
 0x255   : > { %v1428_v7 = vmax.f32 %v1334_v0, 0.0  ;;  %v1466_v12 = vmul.f32 %v2953_v62, %v1427_v4 }
 0x256   : > { %v1464_v40 = vmul.f32 %v2953_v62, %v1425_v39  ;;  %v1426_v58 = vmax.f32 %v1326_v47, 0.0 }
 0x257   : > { %v1467_v14 = vmul.f32 %v2953_v62, %v1428_v7  ;;  %v1519_v18 = vsel %vm1488_vm3, %v1466_v12, 0.0 }
 0x258   : > { %v1513_v41 = vsel %vm1488_vm3, %v1464_v40, 0.0  ;;  %v1465_v6 = vmul.f32 %v2953_v62, %v1426_v58 }
 0x259   : > { %1514 = vadd.xlane.f32.xlu0 %v1513_v41  ;;  %v1522_v26 = vsel %vm1488_vm3, %v1467_v14, 0.0 }
 0x25a   : > { %v1516_v11 = vsel %vm1488_vm3, %v1465_v6, 0.0 }
 0x260   : > { %v2208_v42 = vpop.f32.mrb[76].mxu0 }
 0x261   : > { %v1338_v43 = vpop.f32.mrb[77].mxu0  ;;  %v1347_v27 = vadd.f32 %v2208_v42, %v2946_v57 }
 0x262   : > { %v2209_v45 = vpop.f32.mrb[78].mxu0  ;;  %v1339_v10 = vadd.f32 %v2946_v57, %v1338_v43 }
 0x263   : > { %v1341_v46 = vpop.f32.mrb[79].mxu0  ;;  %v1431_v36 = vmax.f32 %v1347_v27, 0.0  ;;  %v1350_v37 = vadd.f32 %v2209_v45, %v2946_v57 }
 0x264   : > { %v1429_v15 = vmax.f32 %v1339_v10, 0.0  ;;  %v1342_v16 = vadd.f32 %v2946_v57, %v1341_v46 }
 0x265   : > { %v1432_v43 = vmax.f32 %v1350_v37, 0.0  ;;  %v1470_v47 = vmul.f32 %v2953_v62, %v1431_v36 }
 0x266   : > { %v1430_v28 = vmax.f32 %v1342_v16, 0.0  ;;  %v1468_v30 = vmul.f32 %v2953_v62, %v1429_v15 }
 0x268   : > { %v1525_v38 = vsel %vm1488_vm3, %v1468_v30, 0.0  ;;  %v1469_v39 = vmul.f32 %v2953_v62, %v1430_v28 }
 0x26a   : > { %v1528_v46 = vsel %vm1488_vm3, %v1469_v39, 0.0 }
 0x270   : > { %v2212_v48 = vpop.f32.mrb[80].mxu0 }
 0x271   : > { %v1363_v49 = vadd.f32 %v2212_v48, %v2946_v57  ;;  %v1354_v50 = vpop.f32.mrb[81].mxu0 }
 0x272   : > { %v1355_v51 = vadd.f32 %v2946_v57, %v1354_v50  ;;  %v2213_v52 = vpop.f32.mrb[82].mxu0  ;;  %v1531_v50 = vsel %vm1488_vm3, %v1470_v47, 0.0 }
 0x273   : > { %v1435_v53 = vmax.f32 %v1363_v49, 0.0  ;;  %v1366_v54 = vadd.f32 %v2213_v52, %v2946_v57  ;;  %v1357_v55 = vpop.f32.mrb[83].mxu0 }
 0x274   : > { %v1433_v59 = vmax.f32 %v1355_v51, 0.0  ;;  %v1358_v60 = vadd.f32 %v2946_v57, %v1357_v55  ;;  %v1471_v51 = vmul.f32 %v2953_v62, %v1432_v43 }
 0x275   : > { %v1436_v61 = vmax.f32 %v1366_v54, 0.0  ;;  %v1474_v44 = vmul.f32 %v2953_v62, %v1435_v53 }
 0x276   : > { %v1472_v63 = vmul.f32 %v2953_v62, %v1433_v59  ;;  %v1434_v1 = vmax.f32 %v1358_v60, 0.0 }
 0x277   : > { %v1543_v2 = vsel %vm1488_vm3, %v1474_v44, 0.0  ;;  %v1475_v3 = vmul.f32 %v2953_v62, %v1436_v61  ;;  %v1534_v44 = vsel %vm1488_vm3, %v1471_v51, 0.0 }
 0x278   : > { %1544 = vadd.xlane.f32.xlu1 %v1543_v2  ;;  %v1537_v5 = vsel %vm1488_vm3, %v1472_v63, 0.0  ;;  %v1473_v9 = vmul.f32 %v2953_v62, %v1434_v1 }
 0x279   : > { %1538 = vadd.xlane.f32.xlu0 %v1537_v5  ;;  %v1546_v8 = vsel %vm1488_vm3, %v1475_v3, 0.0 }
 0x27a   : > { %v1540_v13 = vsel %vm1488_vm3, %v1473_v9, 0.0 }
 0x27c   : > { %1547 = vadd.xlane.f32.xlu1 %v1546_v8 }
 0x27d   : > { %1517 = vadd.xlane.f32.xlu0 %v1516_v11 }
 0x280   : > { %v2216_v17 = vpop.f32.mrb[84].mxu0  ;;  %1541 = vadd.xlane.f32.xlu1 %v1540_v13 }
 0x281   : > { %v1379_v19 = vadd.f32 %v2216_v17, %v2946_v57  ;;  %v1370_v20 = vpop.f32.mrb[85].mxu0  ;;  %1520 = vadd.xlane.f32.xlu0 %v1519_v18 }
 0x282   : > { %v1371_v21 = vadd.f32 %v2946_v57, %v1370_v20  ;;  %v2217_v22 = vpop.f32.mrb[86].mxu0 }
 0x283   : > { %v1439_v23 = vmax.f32 %v1379_v19, 0.0  ;;  %v1382_v24 = vadd.f32 %v2217_v22, %v2946_v57  ;;  %v1373_v25 = vpop.f32.mrb[87].mxu0 }
 0x284   : > { %v1437_v29 = vmax.f32 %v1371_v21, 0.0  ;;  %v1374_v33 = vadd.f32 %v2946_v57, %v1373_v25 }
 0x285   : > { %1523 = vadd.xlane.f32.xlu0 %v1522_v26  ;;  %v1478_v31 = vmul.f32 %v2953_v62, %v1439_v23  ;;  %v1440_v32 = vmax.f32 %v1382_v24, 0.0 }
 0x286   : > { %v1476_v35 = vmul.f32 %v2953_v62, %v1437_v29  ;;  %v1438_v40 = vmax.f32 %v1374_v33, 0.0 }
 0x287   : > { %v1555_v34 = vsel %vm1488_vm3, %v1478_v31, 0.0  ;;  %v1479_v42 = vmul.f32 %v2953_v62, %v1440_v32 }
 0x288   : > { %1556 = vadd.xlane.f32.xlu1 %v1555_v34  ;;  %v1549_v41 = vsel %vm1488_vm3, %v1476_v35, 0.0  ;;  %v1477_v48 = vmul.f32 %v2953_v62, %v1438_v40 }
 0x289   : > { %1526 = vadd.xlane.f32.xlu0 %v1525_v38  ;;  %v1558_v45 = vsel %vm1488_vm3, %v1479_v42, 0.0 }
 0x28a   : > { %v1552_v60 = vsel %vm1488_vm3, %v1477_v48, 0.0 }
 0x28c   : > { %1550 = vadd.xlane.f32.xlu1 %v1549_v41 }
 0x28d   : > { %1529 = vadd.xlane.f32.xlu0 %v1528_v46 }
 0x290   : > { %v2220_v49 = vpop.f32.mrb[64].mxu1  ;;  %1559 = vadd.xlane.f32.xlu1 %v1558_v45 }
 0x291   : > { %v1395_v52 = vadd.f32 %v2220_v49, %v2946_v57  ;;  %v1386_v53 = vpop.f32.mrb[65].mxu1  ;;  %1532 = vadd.xlane.f32.xlu0 %v1531_v50 }
 0x292   : > { %v1387_v54 = vadd.f32 %v2946_v57, %v1386_v53  ;;  %v2221_v55 = vpop.f32.mrb[66].mxu1 }
 0x293   : > { %v1443_v56 = vmax.f32 %v1395_v52, 0.0  ;;  %v1398_v58 = vadd.f32 %v2221_v55, %v2946_v57  ;;  %v1389_v59 = vpop.f32.mrb[67].mxu1 }
 0x294   : > { %v1441_v61 = vmax.f32 %v1387_v54, 0.0  ;;  %1553 = vadd.xlane.f32.xlu1 %v1552_v60  ;;  %v1390_v1 = vadd.f32 %v2946_v57, %v1389_v59 }
 0x295   : > { %1535 = vadd.xlane.f32.xlu0 %v1534_v44  ;;  %v1482_v63 = vmul.f32 %v2953_v62, %v1443_v56  ;;  %v1444_v0 = vmax.f32 %v1398_v58, 0.0 }
 0x296   : > { %v1480_v3 = vmul.f32 %v2953_v62, %v1441_v61  ;;  %v1442_v4 = vmax.f32 %v1390_v1, 0.0 }
 0x297   : > { %v1567_v2 = vsel %vm1488_vm3, %v1482_v63, 0.0  ;;  %v1483_v6 = vmul.f32 %v2953_v62, %v1444_v0 }
 0x298   : > { %1568 = vadd.xlane.f32.xlu1 %v1567_v2  ;;  %v1561_v5 = vsel %vm1488_vm3, %v1480_v3, 0.0  ;;  %v1481_v8 = vmul.f32 %v2953_v62, %v1442_v4 }
 0x299   : > { %v1570_v7 = vsel %vm1488_vm3, %v1483_v6, 0.0 }
 0x29a   : > { %v1564_v17 = vsel %vm1488_vm3, %v1481_v8, 0.0 }
 0x29c   : > { %1562 = vadd.xlane.f32.xlu1 %v1561_v5 }
 0x2a0   : > { %v2224_v9 = vpop.f32.mrb[68].mxu1  ;;  %1571 = vadd.xlane.f32.xlu1 %v1570_v7 }
 0x2a1   : > { %v1411_v10 = vadd.f32 %v2224_v9, %v2946_v57  ;;  %v1402_v11 = vpop.f32.mrb[69].mxu1 }
 0x2a2   : > { %v1403_v12 = vadd.f32 %v2946_v57, %v1402_v11  ;;  %v2225_v13 = vpop.f32.mrb[70].mxu1 }
 0x2a3   : > { %v1447_v14 = vmax.f32 %v1411_v10, 0.0  ;;  %v1414_v15 = vadd.f32 %v2225_v13, %v2946_v57  ;;  %v1405_v16 = vpop.f32.mrb[71].mxu1 }
 0x2a4   : > { %v1445_v18 = vmax.f32 %v1403_v12, 0.0  ;;  %1565 = vadd.xlane.f32.xlu1 %v1564_v17  ;;  %v1406_v21 = vadd.f32 %v2946_v57, %v1405_v16  ;;  %v3049_v57 = vld [vmem:[#allocation2] ss:$0 sm:$0xff] }
 0x2a5   : > { %v1486_v19 = vmul.f32 %v2953_v62, %v1447_v14  ;;  %v1448_v20 = vmax.f32 %v1414_v15, 0.0 }
 0x2a6   : > { %v1484_v23 = vmul.f32 %v2953_v62, %v1445_v18  ;;  %v1446_v24 = vmax.f32 %v1406_v21, 0.0 }
 0x2a7   : > { %v1579_v22 = vsel %vm1488_vm3, %v1486_v19, 0.0  ;;  %v1487_v26 = vmul.f32 %v2953_v62, %v1448_v20 }
 0x2a8   : > { %1580 = vadd.xlane.f32.xlu1 %v1579_v22  ;;  %v1573_v25 = vsel %vm1488_vm3, %v1484_v23, 0.0  ;;  %v1485_v28 = vmul.f32 %v2953_v62, %v1446_v24 }
 0x2a9   : > { %v1582_v27 = vsel %vm1488_vm3, %v1487_v26, 0.0 }
 0x2aa   : > { %v1576_v29 = vsel %vm1488_vm3, %v1485_v28, 0.0 }
 0x2ac   : > { %1574 = vadd.xlane.f32.xlu1 %v1573_v25 }
 0x2b0   : > { %1583 = vadd.xlane.f32.xlu1 %v1582_v27 }
 0x2b4   : > { %1577 = vadd.xlane.f32.xlu1 %v1576_v29 }
 0x2c5   : > { %v1497_v30 = vpop.xlane.xlu0 %1496 }
 0x2c6   : > { %v1594_v31 = vadd.f32 %v3049_v57, %v1497_v30 }
 0x2c8   : > { %v1494_v32 = vpop.xlane.xlu1 %1493  ;;  %v1626_v37 = vsub.f32 0.0, %v1594_v31 }
 0x2c9   : > { %v1593_v33 = vadd.f32 %v3049_v57, %v1494_v32  ;;  %v1491_v34 = vpop.xlane.xlu0 %1490 }
 0x2ca   : > { %v1592_v35 = vadd.f32 %v3049_v57, %v1491_v34  ;;  %v1660_v42 = vmul.f32 1.442695, %v1626_v37 }
 0x2cb   : > { %v1625_v36 = vsub.f32 0.0, %v1593_v33 }
 0x2cc   : > { %v1624_v38 = vsub.f32 0.0, %v1592_v35 }
 0x2cd   : > { %v1658_v39 = vmul.f32 1.442695, %v1625_v36  ;;  %v1500_v62 = vpop.xlane.xlu0 %1499 }
 0x2ce   : > { %v1656_v40 = vmul.f32 1.442695, %v1624_v38  ;;  %v1595_v41 = vadd.f32 %v3049_v57, %v1500_v62 }
 0x2cf   : > { %2304 = vpow2.f32 %v1658_v39 }
 0x2d0   : > { %2306 = vpow2.f32 %v1656_v40  ;;  %v1627_v43 = vsub.f32 0.0, %v1595_v41 }
 0x2d1   : > { %2308 = vpow2.f32 %v1660_v42 }
 0x2d2   : > { %v1662_v46 = vmul.f32 1.442695, %v1627_v43 }
 0x2d4   : > { %2310 = vpow2.f32 %v1662_v46 }
 0x2d5   : > { %v1509_v47 = vpop.xlane.xlu0 %1508 }
 0x2d6   : > { %v1598_v52 = vadd.f32 %v3049_v57, %v1509_v47 }
 0x2d8   : > { %v1630_v59 = vsub.f32 0.0, %v1598_v52 }
 0x2d9   : > { %v2305_v45 = vpop.eup %2304  ;;  %v1503_v48 = vpop.xlane.xlu0 %1502 }
 0x2da   : > { %v2307_v49 = vpop.eup %2306  ;;  %v1596_v50 = vadd.f32 %v3049_v57, %v1503_v48  ;;  %v1721_v54 = vadd.f32 1.0, %v2305_v45  ;;  %v1668_v1 = vmul.f32 1.442695, %v1630_v59 }
 0x2db   : > { %v1720_v51 = vadd.f32 1.0, %v2307_v49  ;;  %v2309_v56 = vpop.eup %2308 }
 0x2dc   : > { %v1628_v53 = vsub.f32 0.0, %v1596_v50  ;;  %v1722_v61 = vadd.f32 1.0, %v2309_v56 }
 0x2dd   : > { %2312 = vrcp.f32 %v1720_v51  ;;  %v1512_v55 = vpop.xlane.xlu0 %1511 }
 0x2de   : > { %v1664_v58 = vmul.f32 1.442695, %v1628_v53  ;;  %v1599_v60 = vadd.f32 %v3049_v57, %v1512_v55  ;;  %v2311_v63 = vpop.eup %2310 }
 0x2df   : > { %v1723_v4 = vadd.f32 1.0, %v2311_v63 }
 0x2e0   : > { %2314 = vpow2.f32 %v1664_v58  ;;  %v1631_v2 = vsub.f32 0.0, %v1599_v60 }
 0x2e1   : > { %2316 = vrcp.f32 %v1721_v54  ;;  %v1506_v44 = vpop.xlane.xlu0 %1505 }
 0x2e2   : > { %v1597_v0 = vadd.f32 %v3049_v57, %v1506_v44  ;;  %2318 = vrcp.f32 %v1722_v61  ;;  %v1670_v9 = vmul.f32 1.442695, %v1631_v2 }
 0x2e3   : > { %2320 = vpow2.f32 %v1668_v1 }
 0x2e4   : > { %v1629_v3 = vsub.f32 0.0, %v1597_v0 }
 0x2e6   : > { %v1666_v5 = vmul.f32 1.442695, %v1629_v3  ;;  %v1515_v6 = vpop.xlane.xlu0 %1514 }
 0x2e7   : > { %v2313_v7 = vpop.eup %2312  ;;  %v1600_v8 = vadd.f32 %v3049_v57, %v1515_v6 }
 0x2e8   : > { %2322 = vpow2.f32 %v1666_v5  ;;  %1816 = vxpose.xlu0.b32.start [1/16] (narrow) %v2313_v7, 8 }
 0x2e9   : > { %2324 = vrcp.f32 %v1723_v4  ;;  %v1632_v10 = vsub.f32 0.0, %v1600_v8 }
 0x2ea   : > { %v2315_v11 = vpop.eup %2314  ;;  %2326 = vpow2.f32 %v1670_v9 }
 0x2eb   : > { %v2317_v12 = vpop.eup %2316  ;;  %v1724_v13 = vadd.f32 1.0, %v2315_v11  ;;  %v1672_v14 = vmul.f32 1.442695, %v1632_v10 }
 0x2ec   : > { %1817 = vxpose.xlu0.b32.cont [2/16] (narrow) %v2317_v12, 8  ;;  %v2319_v15 = vpop.eup %2318 }
 0x2ed   : > { %2328 = vrcp.f32 %v1724_v13  ;;  %v2321_v16 = vpop.eup %2320 }
 0x2ee   : > { %2330 = vpow2.f32 %v1672_v14  ;;  %v1726_v20 = vadd.f32 1.0, %v2321_v16 }
 0x2f0   : > { %1818 = vxpose.xlu0.b32.cont [3/16] (narrow) %v2319_v15, 8 }
 0x2f2   : > { %v2323_v17 = vpop.eup %2322 }
 0x2f3   : > { %v2325_v18 = vpop.eup %2324  ;;  %v1725_v19 = vadd.f32 1.0, %v2323_v17 }
 0x2f4   : > { %1819 = vxpose.xlu0.b32.cont [4/16] (narrow) %v2325_v18, 8  ;;  %v2327_v21 = vpop.eup %2326 }
 0x2f5   : > { %2332 = vrcp.f32 %v1725_v19  ;;  %v1727_v23 = vadd.f32 1.0, %v2327_v21 }
 0x2f6   : > { %2334 = vrcp.f32 %v1726_v20 }
 0x2f7   : > { %v2329_v22 = vpop.eup %2328  ;;  %2336 = vrcp.f32 %v1727_v23 }
 0x2f8   : > { %1820 = vxpose.xlu0.b32.cont [5/16] (narrow) %v2329_v22, 8  ;;  %v2331_v24 = vpop.eup %2330 }
 0x2f9   : > { %v1728_v25 = vadd.f32 1.0, %v2331_v24 }
 0x2fb   : > { %2338 = vrcp.f32 %v1728_v25 }
 0x2ff   : > { %v2333_v26 = vpop.eup %2332 }
 0x300   : > { %1821 = vxpose.xlu0.b32.cont [6/16] (narrow) %v2333_v26, 8  ;;  %v2335_v27 = vpop.eup %2334 }
 0x301   : > { %v2337_v30 = vpop.eup %2336 }
 0x304   : > { %1822 = vxpose.xlu0.b32.cont [7/16] (narrow) %v2335_v27, 8 }
 0x305   : > { %v1545_v28 = vpop.xlane.xlu1 %1544  ;;  %v2339_v36 = vpop.eup %2338 }
 0x306   : > { %v1539_v29 = vpop.xlane.xlu0 %1538  ;;  %v1610_v31 = vadd.f32 %v3049_v57, %v1545_v28 }
 0x307   : > { %v1608_v32 = vadd.f32 %v3049_v57, %v1539_v29 }
 0x308   : > { %1823 = vxpose.xlu0.b32.cont [8/16] (narrow) %v2337_v30, 8  ;;  %v1642_v37 = vsub.f32 0.0, %v1610_v31 }
 0x309   : > { %v1640_v33 = vsub.f32 0.0, %v1608_v32  ;;  %v1548_v34 = vpop.xlane.xlu1 %1547 }
 0x30a   : > { %v1518_v35 = vpop.xlane.xlu0 %1517  ;;  %v1611_v62 = vadd.f32 %v3049_v57, %v1548_v34  ;;  %v1692_v46 = vmul.f32 1.442695, %v1642_v37 }
 0x30b   : > { %v1688_v38 = vmul.f32 1.442695, %v1640_v33  ;;  %v1601_v39 = vadd.f32 %v3049_v57, %v1518_v35 }
 0x30c   : > { %1824 = vxpose.xlu0.b32.cont [9/16] (narrow) %v2339_v36, 8  ;;  %v1643_v48 = vsub.f32 0.0, %v1611_v62 }
 0x30d   : > { %2340 = vpow2.f32 %v1688_v38  ;;  %v1633_v40 = vsub.f32 0.0, %v1601_v39  ;;  %v1542_v41 = vpop.xlane.xlu1 %1541 }
 0x30e   : > { %v1609_v42 = vadd.f32 %v3049_v57, %v1542_v41  ;;  %v1521_v43 = vpop.xlane.xlu0 %1520  ;;  %v1694_v55 = vmul.f32 1.442695, %v1643_v48 }
 0x30f   : > { %v1674_v47 = vmul.f32 1.442695, %v1633_v40  ;;  %v1602_v45 = vadd.f32 %v3049_v57, %v1521_v43 }
 0x310   : > { %v1641_v49 = vsub.f32 0.0, %v1609_v42 }
 0x311   : > { %2342 = vpow2.f32 %v1674_v47  ;;  %v1634_v50 = vsub.f32 0.0, %v1602_v45 }
 0x312   : > { %v1690_v51 = vmul.f32 1.442695, %v1641_v49  ;;  %v1524_v52 = vpop.xlane.xlu0 %1523  ;;  %2344 = vpow2.f32 %v1692_v46 }
 0x313   : > { %v1676_v53 = vmul.f32 1.442695, %v1634_v50  ;;  %v1603_v54 = vadd.f32 %v3049_v57, %v1524_v52 }
 0x314   : > { %2346 = vpow2.f32 %v1690_v51 }
 0x315   : > { %2348 = vpow2.f32 %v1676_v53  ;;  %v1635_v56 = vsub.f32 0.0, %v1603_v54  ;;  %v1557_v58 = vpop.xlane.xlu1 %1556 }
 0x316   : > { %v1527_v59 = vpop.xlane.xlu0 %1526  ;;  %2350 = vpow2.f32 %v1694_v55  ;;  %v1614_v2 = vadd.f32 %v3049_v57, %v1557_v58 }
 0x317   : > { %v2341_v60 = vpop.eup %2340  ;;  %v1678_v61 = vmul.f32 1.442695, %v1635_v56  ;;  %v1604_v44 = vadd.f32 %v3049_v57, %v1527_v59 }
 0x318   : > { %v1736_v63 = vadd.f32 1.0, %v2341_v60  ;;  %v1646_v14 = vsub.f32 0.0, %v1614_v2 }
 0x319   : > { %v1636_v0 = vsub.f32 0.0, %v1604_v44  ;;  %v1551_v1 = vpop.xlane.xlu1 %1550 }
 0x31a   : > { %2352 = vrcp.f32 %v1736_v63  ;;  %v1612_v3 = vadd.f32 %v3049_v57, %v1551_v1  ;;  %v1530_v4 = vpop.xlane.xlu0 %1529  ;;  %v1700_v29 = vmul.f32 1.442695, %v1646_v14 }
 0x31b   : > { %v2343_v5 = vpop.eup %2342  ;;  %2354 = vpow2.f32 %v1678_v61  ;;  %v1680_v6 = vmul.f32 1.442695, %v1636_v0  ;;  %v1605_v7 = vadd.f32 %v3049_v57, %v1530_v4 }
 0x31c   : > { %v1729_v8 = vadd.f32 1.0, %v2343_v5  ;;  %v1644_v9 = vsub.f32 0.0, %v1612_v3  ;;  %v2345_v10 = vpop.eup %2344 }
 0x31d   : > { %v1637_v11 = vsub.f32 0.0, %v1605_v7  ;;  %v1560_v12 = vpop.xlane.xlu1 %1559  ;;  %v1738_v21 = vadd.f32 1.0, %v2345_v10 }
 0x31e   : > { %v2347_v13 = vpop.eup %2346  ;;  %2356 = vrcp.f32 %v1729_v8  ;;  %v1696_v15 = vmul.f32 1.442695, %v1644_v9  ;;  %v1533_v16 = vpop.xlane.xlu0 %1532  ;;  %v1615_v26 = vadd.f32 %v3049_v57, %v1560_v12 }
 0x31f   : > { %v2349_v17 = vpop.eup %2348  ;;  %v1737_v18 = vadd.f32 1.0, %v2347_v13  ;;  %2358 = vpow2.f32 %v1680_v6  ;;  %v1682_v19 = vmul.f32 1.442695, %v1637_v11  ;;  %v1606_v20 = vadd.f32 %v3049_v57, %v1533_v16 }
 0x320   : > { %v1730_v22 = vadd.f32 1.0, %v2349_v17  ;;  %2360 = vpow2.f32 %v1696_v15  ;;  %v2351_v25 = vpop.eup %2350  ;;  %v1647_v39 = vsub.f32 0.0, %v1615_v26 }
 0x321   : > { %2362 = vrcp.f32 %v1737_v18  ;;  %v1638_v23 = vsub.f32 0.0, %v1606_v20  ;;  %v1554_v24 = vpop.xlane.xlu1 %1553  ;;  %v1739_v35 = vadd.f32 1.0, %v2351_v25 }
 0x322   : > { %2364 = vrcp.f32 %v1730_v22  ;;  %v1613_v27 = vadd.f32 %v3049_v57, %v1554_v24  ;;  %v1536_v28 = vpop.xlane.xlu0 %1535  ;;  %v1702_v45 = vmul.f32 1.442695, %v1647_v39 }
 0x323   : > { %2366 = vpow2.f32 %v1682_v19  ;;  %v1684_v30 = vmul.f32 1.442695, %v1638_v23  ;;  %v1607_v31 = vadd.f32 %v3049_v57, %v1536_v28 }
 0x324   : > { %v2353_v32 = vpop.eup %2352  ;;  %2368 = vrcp.f32 %v1738_v21  ;;  %v1645_v33 = vsub.f32 0.0, %v1613_v27 }
 0x325   : > { %v2355_v34 = vpop.eup %2354  ;;  %2370 = vpow2.f32 %v1684_v30  ;;  %v1639_v36 = vsub.f32 0.0, %v1607_v31  ;;  %v1569_v37 = vpop.xlane.xlu1 %1568  ;;  %1848 = vxpose.xlu1.b32.start [1/16] (narrow) %v2353_v32, 8 }
 0x326   : > { %v1731_v38 = vadd.f32 1.0, %v2355_v34  ;;  %v1698_v62 = vmul.f32 1.442695, %v1645_v33  ;;  %2372 = vpow2.f32 %v1700_v29  ;;  %v1618_v58 = vadd.f32 %v3049_v57, %v1569_v37 }
 0x327   : > { %v1686_v40 = vmul.f32 1.442695, %v1639_v36 }
 0x328   : > { %v2357_v41 = vpop.eup %2356  ;;  %2374 = vrcp.f32 %v1731_v38  ;;  %v1650_v1 = vsub.f32 0.0, %v1618_v58 }
 0x329   : > { %v2359_v42 = vpop.eup %2358  ;;  %2376 = vrcp.f32 %v1739_v35  ;;  %v1563_v43 = vpop.xlane.xlu1 %1562  ;;  %1825 = vxpose.xlu0.b32.cont [10/16] (narrow) %v2357_v41, 8 }
 0x32a   : > { %v2361_v46 = vpop.eup %2360  ;;  %v1732_v47 = vadd.f32 1.0, %v2359_v42  ;;  %2378 = vpow2.f32 %v1698_v62  ;;  %v1616_v48 = vadd.f32 %v3049_v57, %v1563_v43  ;;  %v1708_v12 = vmul.f32 1.442695, %v1650_v1 }
 0x32b   : > { %v2363_v49 = vpop.eup %2362  ;;  %v1740_v50 = vadd.f32 1.0, %v2361_v46  ;;  %2380 = vpow2.f32 %v1686_v40  ;;  %v2500_v1 = vmov 1966171168  }
 0x32c   : > { %v2365_v51 = vpop.eup %2364  ;;  %2382 = vrcp.f32 %v1732_v47  ;;  %v1648_v52 = vsub.f32 0.0, %v1616_v48  ;;  %1849 = vxpose.xlu1.b32.cont [2/16] (narrow) %v2363_v49, 8 }
 0x32d   : > { %v2367_v53 = vpop.eup %2366  ;;  %2384 = vrcp.f32 %v1740_v50  ;;  %v1572_v54 = vpop.xlane.xlu1 %1571  ;;  %1826 = vxpose.xlu0.b32.cont [11/16] (narrow) %v2365_v51, 8 }
 0x32e   : > { %v2369_v55 = vpop.eup %2368  ;;  %v1733_v56 = vadd.f32 1.0, %v2367_v53  ;;  %2386 = vpow2.f32 %v1702_v45  ;;  %v1704_v60 = vmul.f32 1.442695, %v1648_v52  ;;  %v1619_v2 = vadd.f32 %v3049_v57, %v1572_v54 }
 0x32f   : > { %v2371_v59 = vpop.eup %2370 }
 0x330   : > { %2388 = vrcp.f32 %v1733_v56  ;;  %v1734_v61 = vadd.f32 1.0, %v2371_v59  ;;  %1850 = vxpose.xlu1.b32.cont [3/16] (narrow) %v2369_v55, 8  ;;  %v2373_v44 = vpop.eup %2372  ;;  %v1651_v13 = vsub.f32 0.0, %v1619_v2  ;;  %v1884_v2 = vunpack.c.l.s4 %v2500_v1 }
 0x331   : > { %v1566_v63 = vpop.xlane.xlu1 %1565  ;;  %v1742_v16 = vadd.f32 1.0, %v2373_v44 }
 0x332   : > { %v2375_v0 = vpop.eup %2374  ;;  %2390 = vrcp.f32 %v1734_v61  ;;  %v1617_v3 = vadd.f32 %v3049_v57, %v1566_v63  ;;  %v1710_v20 = vmul.f32 1.442695, %v1651_v13 }
 0x333   : > { %v2377_v4 = vpop.eup %2376  ;;  %2392 = vpow2.f32 %v1704_v60  ;;  %1827 = vxpose.xlu0.b32.cont [12/16] (narrow) %v2375_v0, 8 }
 0x334   : > { %v2379_v5 = vpop.eup %2378  ;;  %v1649_v6 = vsub.f32 0.0, %v1617_v3  ;;  %1851 = vxpose.xlu1.b32.cont [4/16] (narrow) %v2377_v4, 8  ;;  %v1886_v3 = vlaneseq  ;;  %v1885_v4 = vunpack.c.0.s8 %v1884_v2 }
 0x335   : > { %v2381_v7 = vpop.eup %2380  ;;  %v1741_v8 = vadd.f32 1.0, %v2379_v5  ;;  %v1581_v9 = vpop.xlane.xlu1 %1580 }
 0x336   : > { %v2383_v10 = vpop.eup %2382  ;;  %v1735_v11 = vadd.f32 1.0, %v2381_v7  ;;  %v1706_v14 = vmul.f32 1.442695, %v1649_v6  ;;  %v1622_v27 = vadd.f32 %v3049_v57, %v1581_v9  ;;  %v1887_v5 = vshrl.u32 %v1886_v3, 7 }
 0x337   : > { %v2385_v15 = vpop.eup %2384  ;;  %2394 = vrcp.f32 %v1741_v8  ;;  %1828 = vxpose.xlu0.b32.cont [13/16] (narrow) %v2383_v10, 8  ;;  %vm1900_vm4 = vcmp.lt.s32.totalorder %v1886_v3, 256 }
 0x338   : > { %v2387_v17 = vpop.eup %2386  ;;  %2396 = vrcp.f32 %v1735_v11  ;;  %1852 = vxpose.xlu1.b32.cont [5/16] (narrow) %v2385_v15, 8  ;;  %v1654_v33 = vsub.f32 0.0, %v1622_v27  ;;  %v1888_v7 = vsub.s32 %v1885_v4, %v1887_v5 }
 0x339   : > { %2398 = vpow2.f32 %v1706_v14  ;;  %v1575_v18 = vpop.xlane.xlu1 %1574  ;;  %v1743_v22 = vadd.f32 1.0, %v2387_v17 }
 0x33a   : > { %v2389_v19 = vpop.eup %2388  ;;  %2400 = vpow2.f32 %v1708_v12  ;;  %v1620_v21 = vadd.f32 %v3049_v57, %v1575_v18  ;;  %v1716_v40 = vmul.f32 1.442695, %v1654_v33 }
 0x33b   : > { %2402 = vrcp.f32 %v1742_v16  ;;  %1829 = vxpose.xlu0.b32.cont [14/16] (narrow) %v2389_v19, 8 }
 0x33c   : > { %v2391_v23 = vpop.eup %2390  ;;  %v1652_v24 = vsub.f32 0.0, %v1620_v21  ;;  %2404 = vpow2.f32 %v1710_v20 }
 0x33d   : > { %v2393_v25 = vpop.eup %2392  ;;  %v1584_v26 = vpop.xlane.xlu1 %1583  ;;  %2406 = vrcp.f32 %v1743_v22 }
 0x33e   : > { %v1712_v28 = vmul.f32 1.442695, %v1652_v24  ;;  %v1744_v29 = vadd.f32 1.0, %v2393_v25  ;;  %v1623_v34 = vadd.f32 %v3049_v57, %v1584_v26 }
 0x33f   : > { %1830 = vxpose.xlu0.b32.cont [15/16] (narrow) %v2391_v23, 8 }
 0x340   : > { %2408 = vpow2.f32 %v1712_v28  ;;  %v1655_v41 = vsub.f32 0.0, %v1623_v34 }
 0x341   : > { %v2395_v30 = vpop.eup %2394  ;;  %v1578_v31 = vpop.xlane.xlu1 %1577  ;;  %2410 = vrcp.f32 %v1744_v29 }
 0x342   : > { %v2397_v32 = vpop.eup %2396  ;;  %1853 = vxpose.xlu1.b32.cont [6/16] (narrow) %v2395_v30, 8  ;;  %v1621_v35 = vadd.f32 %v3049_v57, %v1578_v31  ;;  %v1718_v45 = vmul.f32 1.442695, %v1655_v41 }
 0x343   : > { %v2399_v36 = vpop.eup %2398  ;;  %1831 = vxpose.xlu0.b32.end [16/16] (narrow) %v2397_v32, 8 }
 0x344   : > { %v2401_v37 = vpop.eup %2400  ;;  %v1745_v38 = vadd.f32 1.0, %v2399_v36  ;;  %v1653_v39 = vsub.f32 0.0, %v1621_v35 }
 0x345   : > { %v2403_v62 = vpop.eup %2402  ;;  %v1746_v43 = vadd.f32 1.0, %v2401_v37 }
 0x346   : > { %2412 = vrcp.f32 %v1745_v38  ;;  %v1714_v42 = vmul.f32 1.442695, %v1653_v39  ;;  %1854 = vxpose.xlu1.b32.cont [7/16] (narrow) %v2403_v62, 8  ;;  %v2405_v46 = vpop.eup %2404 }
 0x347   : > { %v2407_v47 = vpop.eup %2406  ;;  %v1747_v57 = vadd.f32 1.0, %v2405_v46 }
 0x348   : > { %2414 = vpow2.f32 %v1714_v42 }
 0x349   : > { %2416 = vpow2.f32 %v1716_v40 }
 0x34a   : > { %1855 = vxpose.xlu1.b32.cont [8/16] (narrow) %v2407_v47, 8  ;;  %2418 = vrcp.f32 %v1746_v43  ;;  %v2409_v48 = vpop.eup %2408 }
 0x34b   : > { %v2411_v49 = vpop.eup %2410  ;;  %2420 = vpow2.f32 %v1718_v45  ;;  %v1748_v50 = vadd.f32 1.0, %v2409_v48 }
 0x34c   : > { %2422 = vrcp.f32 %v1747_v57 }
 0x34d   : > { %2424 = vrcp.f32 %v1748_v50 }
 0x34e   : > { %1856 = vxpose.xlu1.b32.cont [9/16] (narrow) %v2411_v49, 8 }
 0x350   : > { %v2413_v51 = vpop.eup %2412 }
 0x352   : > { %v2415_v52 = vpop.eup %2414  ;;  %1857 = vxpose.xlu1.b32.cont [10/16] (narrow) %v2413_v51, 8 }
 0x353   : > { %v1749_v53 = vadd.f32 1.0, %v2415_v52  ;;  %v2417_v54 = vpop.eup %2416 }
 0x354   : > { %v2419_v55 = vpop.eup %2418  ;;  %v1750_v56 = vadd.f32 1.0, %v2417_v54 }
 0x355   : > { %2426 = vrcp.f32 %v1749_v53  ;;  %v2421_v58 = vpop.eup %2420 }
 0x356   : > { %1858 = vxpose.xlu1.b32.cont [11/16] (narrow) %v2419_v55, 8  ;;  %v2423_v59 = vpop.eup %2422  ;;  %2428 = vrcp.f32 %v1750_v56  ;;  %v1751_v60 = vadd.f32 1.0, %v2421_v58 }
 0x357   : > { %v2425_v61 = vpop.eup %2424 }
 0x358   : > { %2430 = vrcp.f32 %v1751_v60 }
 0x35a   : > { %1859 = vxpose.xlu1.b32.cont [12/16] (narrow) %v2423_v59, 8 }
 0x35e   : > { %1860 = vxpose.xlu1.b32.cont [13/16] (narrow) %v2425_v61, 8 }
 0x35f   : > { %v2427_v44 = vpop.eup %2426 }
 0x360   : > { %v2429_v63 = vpop.eup %2428 }
 0x362   : > { %1861 = vxpose.xlu1.b32.cont [14/16] (narrow) %v2427_v44, 8  ;;  %v2431_v0 = vpop.eup %2430 }
 0x366   : > { %1862 = vxpose.xlu1.b32.cont [15/16] (narrow) %v2429_v63, 8 }
 0x36a   : > { %1863 = vxpose.xlu1.b32.end [16/16] (narrow) %v2431_v0, 8 }
 0x387   : > { %v1832_v6 = vpop.trf.xlu0 }
 0x3ae   : > { %v1864_v8 = vpop.trf.xlu1 }
 0x3af   : > { %v1882_v9 = vcombine.low %v1832_v6, %v1864_v8 }
 0x3b1   : > { %v1889_v10 = vrot.slane %v1882_v9, %v1888_v7 }
 0x3b3   : > { %v1896_v11 = vrot.slane %v1889_v10, %v1888_v7 }
 0x3b5   : > { %1902 = vst.msk [vmem:[%s312_s11] sm:$0x3] %vm1900_vm4, %v1896_v11 }
 0x3b6 PF: > { %p19_p9 = scmp.ge.s32.totalorder %s2564_s30, 4   ;;  %s3110_s26 = smov %s2486_s27 }
 0x3b7   : > { %s3111_s27 = smov %s2490_s28  ;;  %s3112_s28 = smov %s2574_s10 }
 0x3b8   : > { %s3113_s29 = smov %s2564_s30  ;;  %21 = sbr.rel (!%p19_p9) target bundleno = 6 (0x6), region = 88 }
 0x3bf   :  { %1923 = vsyncpa [#allocation4], 1 }
 0x3c0   :  { %1925 = vsyncpa [#allocation4 + $0x1], 1 }

</bundles_post_ra>
